<compile_context>
chip_gen: v6e
topology: v6e:2x2x1
jax: 0.10.0
libtpu: 0.0.40
codegen_flags: <defaults>
</compile_context>

<pallas_src>
from functools import partial

import jax
import jax.numpy as jnp
from jax.experimental import pallas as pl
from jax.experimental.pallas import tpu as pltpu

# ----------------------------- configuration ------------------------------
CHIN = 1
CHOUT = 1
HIDDEN = 32          # (module default 48; kept small & head-divisible)
KERNEL = 8
STRIDE = 4
PAD = 2
NUM_HEADS = 4
HEAD_DIM = HIDDEN // NUM_HEADS
D_EMB = 32           # speaker-embedding width
VIDEO_CHIN = 32      # (module default 512; kept small)
FLOOR = 1e-3

_F32 = jnp.float32
_BF16 = jnp.bfloat16


# --------------------------- EmbeddingV kernel -----------------------------
def _embv_kernel(x_ref, w1_ref, b1_ref, w2_ref, b2_ref, o_ref):
    """Fused 2-layer MLP: relu(x@w1+b1)@w2+b2, bf16 MXU inputs, f32 accum."""
    h = jnp.dot(x_ref[...].astype(_BF16), w1_ref[...],
                preferred_element_type=_F32) + b1_ref[...]
    h = jnp.maximum(h, 0.0)
    o = jnp.dot(h.astype(_BF16), w2_ref[...],
                preferred_element_type=_F32) + b2_ref[...]
    o_ref[...] = o.astype(o_ref.dtype)


def embv_mlp(p, x):
    M, K = x.shape
    H1 = p["w1"].shape[1]
    H2 = p["w2"].shape[1]
    return pl.pallas_call(
        _embv_kernel,
        out_shape=jax.ShapeDtypeStruct((M, H2), _F32),
        grid=(1,),
        in_specs=[
            pl.BlockSpec((M, K), lambda i: (0, 0)),
            pl.BlockSpec((K, H1), lambda i: (0, 0)),
            pl.BlockSpec((1, H1), lambda i: (0, 0)),
            pl.BlockSpec((H1, H2), lambda i: (0, 0)),
            pl.BlockSpec((1, H2), lambda i: (0, 0)),
        ],
        out_specs=pl.BlockSpec((M, H2), lambda i: (0, 0)),
        compiler_params=pltpu.CompilerParams(
            dimension_semantics=("arbitrary",)),
    )(x.astype(_F32), p["w1"], p["b1"], p["w2"], p["b2"])


def embedding_v(p, mixture, audios, video_features, speaker_embedding, ids):
    """Synthetic visual/audio speaker embedder -> (bs * n_spk, D_EMB)."""
    del ids  # TODO(synk): original EmbeddingV may use embedding ids internally
    bs = mixture.shape[0]
    n_spk = audios.shape[1]
    vc = video_features.shape[-1]
    mix_mean = jnp.mean(mixture, axis=(1, 2))
    mix_std = jnp.std(mixture, axis=(1, 2))
    aud_mean = jnp.mean(audios, axis=-1)
    aud_std = jnp.std(audios, axis=-1)
    vid_pool = jnp.mean(video_features, axis=1)
    feats = jnp.concatenate([
        jnp.broadcast_to(mix_mean[:, None, None], (bs, n_spk, 1)),
        jnp.broadcast_to(mix_std[:, None, None], (bs, n_spk, 1)),
        aud_mean[..., None],
        aud_std[..., None],
        speaker_embedding,
        jnp.broadcast_to(vid_pool[:, None, :], (bs, n_spk, vc)),
    ], axis=-1)
    flat = feats.reshape(bs * n_spk, -1)
    return embv_mlp(p, flat)


# ------------------------ fused VoiceFormerAE kernel ------------------------
def _fused_ae_kernel(x_ref, vf_ref, spk_ref,
                     enc_w_ref, enc_b_ref, enc2_w_ref, enc2_b_ref,
                     vid_w_ref, vid_b_ref, spk_w_ref, spk_b_ref,
                     qkv_w_ref, qkv_b_ref, proj_w_ref, proj_b_ref,
                     dec1_w_ref, dec1_b_ref, dec2_wt_ref,
                     o_ref, *, Tp):
    """One batch element, everything VMEM-resident from encoder to decoder."""
    # ---- encoder: strided conv (kernel == 2*stride) as a single matmul ----
    xb = x_ref[0]                                   # (Tp+1, STRIDE) f32
    patches = jnp.concatenate([xb[0:Tp, :], xb[1:Tp + 1, :]], axis=-1)  # (Tp, K)
    h = jnp.dot(patches.astype(_BF16), enc_w_ref[...],
                preferred_element_type=_F32) + enc_b_ref[...]
    h = jnp.maximum(h, 0.0)                         # (Tp, HIDDEN)

    # ---- 1x1 conv + GLU ----
    g = jnp.dot(h.astype(_BF16), enc2_w_ref[...],
                preferred_element_type=_F32) + enc2_b_ref[...]
    h = g[:, :HIDDEN] * jax.nn.sigmoid(g[:, HIDDEN:])

    # ---- video (pre-pooled in XLA) + speaker conditioning ----
    vid_pool = jnp.dot(vf_ref[0].astype(_BF16), vid_w_ref[...],
                       preferred_element_type=_F32) + vid_b_ref[...]   # (1,H)
    s = jnp.dot(spk_ref[0].astype(_BF16), spk_w_ref[...],
                preferred_element_type=_F32) + spk_b_ref[...]
    spk_h = jnp.maximum(s, 0.0)                     # (1, HIDDEN)
    h = h + vid_pool + spk_h

    # ---- multi-head self-attention (fused QKV, static head loop) ----
    qkv = jnp.dot(h.astype(_BF16), qkv_w_ref[...],
                  preferred_element_type=_F32) + qkv_b_ref[...]
    q = qkv[:, 0 * HIDDEN:1 * HIDDEN]
    k = qkv[:, 1 * HIDDEN:2 * HIDDEN]
    vv = qkv[:, 2 * HIDDEN:3 * HIDDEN]
    scale = 1.0 / (HEAD_DIM ** 0.5)
    heads = []
    for hd in range(NUM_HEADS):
        lo, hi = hd * HEAD_DIM, (hd + 1) * HEAD_DIM
        qh = q[:, lo:hi].astype(_BF16)
        kh = k[:, lo:hi].astype(_BF16)
        vh = vv[:, lo:hi].astype(_BF16)
        sc = jax.lax.dot_general(qh, kh, (((1,), (1,)), ((), ())),
                                 preferred_element_type=_F32) * scale
        sc = sc - jnp.max(sc, axis=-1, keepdims=True)
        p_ = jnp.exp(sc)
        inv = pl.reciprocal(jnp.sum(p_, axis=-1, keepdims=True), approx=True)
        p_ = p_ * inv
        heads.append(jnp.dot(p_.astype(_BF16), vh,
                             preferred_element_type=_F32))
    attn = jnp.concatenate(heads, axis=-1)          # (Tp, HIDDEN)
    h = h + jnp.dot(attn.astype(_BF16), proj_w_ref[...],
                    preferred_element_type=_F32) + proj_b_ref[...]

    # ---- decoder: 1x1 conv + GLU, then transposed-conv per-window taps ----
    g = jnp.dot(h.astype(_BF16), dec1_w_ref[...],
                preferred_element_type=_F32) + dec1_b_ref[...]
    d = g[:, :HIDDEN] * jax.nn.sigmoid(g[:, HIDDEN:])
    # Transposed orientation: (KERNEL, HIDDEN) @ (Tp, HIDDEN)^T -> (KERNEL, Tp)
    # Time sits on lanes (lane-dense store for realistic T); KERNEL==8 fills
    # the sublanes of one vreg exactly.
    y_t = jax.lax.dot_general(dec2_wt_ref[...], d.astype(_BF16),
                              (((1,), (1,)), ((), ())),
                              preferred_element_type=_F32)   # (KERNEL*CHOUT,Tp)
    o_ref[0] = y_t.astype(o_ref.dtype)


def fused_ae_call(p, xp_blocks, vid_mean, spk, Tp):
    bs, nblk, stride = xp_blocks.shape
    Vc = vid_mean.shape[-1]

    def dmap(b):
        return (b, 0, 0)

    def wmap(b):
        return (0, 0)

    in_specs = [
        pl.BlockSpec((1, nblk, stride), dmap),            # stride-folded input
        pl.BlockSpec((1, 1, Vc), dmap),                   # pre-pooled video
        pl.BlockSpec((1, 1, D_EMB), dmap),                # selected speaker emb
        pl.BlockSpec((KERNEL * CHIN, HIDDEN), wmap),      # enc_w
        pl.BlockSpec((1, HIDDEN), wmap),                  # enc_b
        pl.BlockSpec((HIDDEN, 2 * HIDDEN), wmap),         # enc2_w
        pl.BlockSpec((1, 2 * HIDDEN), wmap),              # enc2_b
        pl.BlockSpec((Vc, HIDDEN), wmap),                 # vid_w
        pl.BlockSpec((1, HIDDEN), wmap),                  # vid_b
        pl.BlockSpec((D_EMB, HIDDEN), wmap),              # spk_w
        pl.BlockSpec((1, HIDDEN), wmap),                  # spk_b
        pl.BlockSpec((HIDDEN, 3 * HIDDEN), wmap),         # qkv_w
        pl.BlockSpec((1, 3 * HIDDEN), wmap),              # qkv_b
        pl.BlockSpec((HIDDEN, HIDDEN), wmap),             # proj_w
        pl.BlockSpec((1, HIDDEN), wmap),                  # proj_b
        pl.BlockSpec((HIDDEN, 2 * HIDDEN), wmap),         # dec1_w
        pl.BlockSpec((1, 2 * HIDDEN), wmap),              # dec1_b
        pl.BlockSpec((KERNEL * CHOUT, HIDDEN), wmap),     # dec2_wt (transposed)
    ]
    return pl.pallas_call(
        partial(_fused_ae_kernel, Tp=Tp),
        out_shape=jax.ShapeDtypeStruct((bs, KERNEL * CHOUT, Tp), _F32),
        grid=(bs,),
        in_specs=in_specs,
        out_specs=pl.BlockSpec((1, KERNEL * CHOUT, Tp), dmap),
        compiler_params=pltpu.CompilerParams(
            dimension_semantics=("parallel",)),
    )(xp_blocks, vid_mean, spk,
      p["enc_w"], p["enc_b"], p["enc2_w"], p["enc2_b"],
      p["vid_w"], p["vid_b"], p["spk_w"], p["spk_b"],
      p["qkv_w"], p["qkv_b"], p["proj_w"], p["proj_b"],
      p["dec1_w"], p["dec1_b"], p["dec2_wt"])


def voiceformer_ae(p, mixture, audios, video_features, v_spk_emb, ids):
    """Synthetic separation net: demucs-style encoder + MHSA + decoder."""
    del audios  # TODO(synk): original AE may also condition on reference audios
    bs, chin, T = mixture.shape
    assert chin == CHIN == 1 and KERNEL == 2 * STRIDE
    assert (T + 2 * PAD) % STRIDE == 0

    # demucs-style input normalization (tiny, plain XLA)
    mono = jnp.mean(mixture, axis=1, keepdims=True)
    std = jnp.std(mono, axis=-1, keepdims=True)                # (bs,1,1)
    x = mixture / (FLOOR + std)

    # stride-folded padded input (free XLA reshape) -> in-kernel windowing
    Tp = (T + 2 * PAD - KERNEL) // STRIDE + 1
    xp = jnp.pad(x[:, 0, :], ((0, 0), (PAD, PAD)))             # (bs, T+2*PAD)
    xp_blocks = xp.reshape(bs, Tp + 1, STRIDE)

    # frame mean-pool commutes with the linear video-conditioning layer:
    # pre-pool in XLA so the kernel only DMAs (bs,1,Vc) instead of (bs,F,Vc).
    vid_mean = jnp.mean(video_features, axis=1, keepdims=True)

    # speaker conditioning: v_spk_emb is (bs, D_EMB, n_spk); pick target
    spk = v_spk_emb[jnp.arange(bs), :, ids]                    # (bs, D_EMB)
    spk = spk[:, None, :]                                      # (bs,1,D_EMB)

    # one fused Pallas kernel: encoder -> MHSA -> decoder taps
    y = fused_ae_call(p, xp_blocks, vid_mean, spk, Tp)   # (bs, KERNEL, Tp)

    # transposed-conv overlap-add: kernel==2*stride -> exactly two taps,
    # done as shifted adds (no scatter), then crop padding, bias, denorm.
    yA = jnp.transpose(y[:, :STRIDE, :], (0, 2, 1)).reshape(bs, Tp * STRIDE)
    yB = jnp.transpose(y[:, STRIDE:, :], (0, 2, 1)).reshape(bs, Tp * STRIDE)
    full = (jnp.pad(yA, ((0, 0), (0, STRIDE)))
            + jnp.pad(yB, ((0, 0), (STRIDE, 0))))              # (bs, T+2*PAD)
    out = full[:, PAD:PAD + T] + p["dec2_b"][0]                # (bs, T)
    return out[:, None, :] * std                               # (bs, 1, T)


# ----------------------------- VoiceFormerVEM ------------------------------
def voiceformer_vem(params, mixture, audios, video_features, speaker_embedding,
                    emmbeding_ids, face_embedding):
    del face_embedding  # unused in the reference forward as well
    bs = mixture.shape[0]
    # torch.no_grad() -> stop_gradient
    v = jax.lax.stop_gradient(
        embedding_v(params["embv"], mixture, audios, video_features,
                    speaker_embedding, emmbeding_ids))
    v = v.reshape(bs, v.shape[0] // bs, -1)                    # (bs, n_spk, D)
    v = jnp.transpose(v, (0, 2, 1))                            # permute(0,2,1)
    return voiceformer_ae(params["ae"], mixture, audios, video_features,
                          v, emmbeding_ids)


# ------------------------------- parameters --------------------------------
def init_params(key):
    ks = jax.random.split(key, 16)

    def w(k, shape):  # bf16 MXU operands
        return (0.1 * jax.random.normal(k, shape, _F32)).astype(_BF16)

    def b(n):         # f32 biases, pre-shaped (1, N) for lane broadcast
        return jnp.zeros((1, n), _F32)

    feat_dim = 4 + D_EMB + VIDEO_CHIN
    embv = dict(
        w1=w(ks[0], (feat_dim, 64)), b1=b(64),
        w2=w(ks[1], (64, D_EMB)), b2=b(D_EMB),
    )
    ae = dict(
        enc_w=w(ks[2], (KERNEL * CHIN, HIDDEN)), enc_b=b(HIDDEN),
        enc2_w=w(ks[3], (HIDDEN, 2 * HIDDEN)), enc2_b=b(2 * HIDDEN),
        vid_w=w(ks[4], (VIDEO_CHIN, HIDDEN)), vid_b=b(HIDDEN),
        spk_w=w(ks[5], (D_EMB, HIDDEN)), spk_b=b(HIDDEN),
        qkv_w=w(ks[6], (HIDDEN, 3 * HIDDEN)), qkv_b=b(3 * HIDDEN),
        proj_w=w(ks[7], (HIDDEN, HIDDEN)), proj_b=b(HIDDEN),
        dec1_w=w(ks[8], (HIDDEN, 2 * HIDDEN)), dec1_b=b(2 * HIDDEN),
        dec2_wt=w(ks[9], (KERNEL * CHOUT, HIDDEN)),   # stored transposed
        dec2_b=jnp.zeros((CHOUT,), _F32),
    )
    return dict(embv=embv, ae=ae)


# ---------------------------------- main ------------------------------------
if __name__ == "__main__":
    key = jax.random.PRNGKey(0)
    kx = jax.random.split(key, 8)

    bs, T = 2, 64
    n_spk, n_frames = 2, 8

    mixture = jax.random.normal(kx[0], (bs, CHIN, T), _F32)
    audios = jax.random.normal(kx[1], (bs, n_spk, T), _F32)
    video_features = jax.random.normal(kx[2], (bs, n_frames, VIDEO_CHIN), _F32)
    speaker_embedding = jax.random.normal(kx[3], (bs, n_spk, D_EMB), _F32)
    emmbeding_ids = jnp.array([0, 1], dtype=jnp.int32)
    face_embedding = jax.random.normal(kx[4], (bs, D_EMB), _F32)  # unused

    params = init_params(kx[5])

    fwd = jax.jit(voiceformer_vem)
    out = fwd(params, mixture, audios, video_features,
              speaker_embedding, emmbeding_ids, face_embedding)
    jax.block_until_ready(out)
    assert out.shape == (bs, CHOUT, T), out.shape
    print("KERNEL_OK")
</pallas_src>

<mosaic_0001>
module attributes {stable_mosaic.version = 11 : i64} {
  func.func @_embv_kernel(%arg0: i32, %arg1: memref<4x68xf32, #tpu.memory_space<vmem>>, %arg2: memref<68x64xbf16, #tpu.memory_space<vmem>>, %arg3: memref<1x64xf32, #tpu.memory_space<vmem>>, %arg4: memref<64x32xbf16, #tpu.memory_space<vmem>>, %arg5: memref<1x32xf32, #tpu.memory_space<vmem>>, %arg6: memref<4x32xf32, #tpu.memory_space<vmem>>) attributes {dimension_semantics = [#tpu.dimension_semantics<arbitrary>], iteration_bounds = array<i64: 1>, scalar_prefetch = 0 : i64, scratch_operands = 0 : i64, tpu.core_type = #tpu.core_type<tc>, window_params = [{pipeline_mode = #tpu.pipeline_mode<synchronous>, transform_indices = @transform_0, window_bounds = array<i64: 4, 68>}, {pipeline_mode = #tpu.pipeline_mode<synchronous>, transform_indices = @transform_1, window_bounds = array<i64: 68, 64>}, {pipeline_mode = #tpu.pipeline_mode<synchronous>, transform_indices = @transform_2, window_bounds = array<i64: 1, 64>}, {pipeline_mode = #tpu.pipeline_mode<synchronous>, transform_indices = @transform_3, window_bounds = array<i64: 64, 32>}, {pipeline_mode = #tpu.pipeline_mode<synchronous>, transform_indices = @transform_4, window_bounds = array<i64: 1, 32>}, {pipeline_mode = #tpu.pipeline_mode<synchronous>, transform_indices = @transform_5, window_bounds = array<i64: 4, 32>}]} {
    %c0 = arith.constant 0 : index
    %c0_0 = arith.constant 0 : index
    %0 = vector.load %arg1[%c0, %c0_0] : memref<4x68xf32, #tpu.memory_space<vmem>>, vector<4x68xf32>
    %1 = arith.truncf %0 : vector<4x68xf32> to vector<4x68xbf16>
    %c0_1 = arith.constant 0 : index
    %c0_2 = arith.constant 0 : index
    %2 = vector.load %arg2[%c0_1, %c0_2] : memref<68x64xbf16, #tpu.memory_space<vmem>>, vector<68x64xbf16>
    %cst = arith.constant dense<0.000000e+00> : vector<4x64xf32>
    %3 = tpu.matmul %1, %2, %cst {dimension_numbers = #tpu.dot_dimension_numbers<[1], [0], [0], [1], [0, 0, 1, 1], [], []>} : vector<4x68xbf16>, vector<68x64xbf16>, vector<4x64xf32> -> vector<4x64xf32>
    %c0_3 = arith.constant 0 : index
    %c0_4 = arith.constant 0 : index
    %4 = vector.load %arg3[%c0_3, %c0_4] : memref<1x64xf32, #tpu.memory_space<vmem>>, vector<1x64xf32>
    %5 = vector.broadcast %4 : vector<1x64xf32> to vector<4x64xf32>
    %6 = arith.addf %3, %5 : vector<4x64xf32>
    %cst_5 = arith.constant 0.000000e+00 : f32
    %7 = vector.broadcast %cst_5 : f32 to vector<4x64xf32>
    %8 = arith.maximumf %6, %7 : vector<4x64xf32>
    %9 = arith.truncf %8 : vector<4x64xf32> to vector<4x64xbf16>
    %c0_6 = arith.constant 0 : index
    %c0_7 = arith.constant 0 : index
    %10 = vector.load %arg4[%c0_6, %c0_7] : memref<64x32xbf16, #tpu.memory_space<vmem>>, vector<64x32xbf16>
    %cst_8 = arith.constant dense<0.000000e+00> : vector<4x32xf32>
    %11 = tpu.matmul %9, %10, %cst_8 {dimension_numbers = #tpu.dot_dimension_numbers<[1], [0], [0], [1], [0, 0, 1, 1], [], []>} : vector<4x64xbf16>, vector<64x32xbf16>, vector<4x32xf32> -> vector<4x32xf32>
    %c0_9 = arith.constant 0 : index
    %c0_10 = arith.constant 0 : index
    %12 = vector.load %arg5[%c0_9, %c0_10] : memref<1x32xf32, #tpu.memory_space<vmem>>, vector<1x32xf32>
    %13 = vector.broadcast %12 : vector<1x32xf32> to vector<4x32xf32>
    %14 = arith.addf %11, %13 : vector<4x32xf32>
    %c0_11 = arith.constant 0 : index
    %c0_12 = arith.constant 0 : index
    %15 = vector.load %arg6[%c0_11, %c0_12] : memref<4x32xf32, #tpu.memory_space<vmem>>, vector<4x32xf32>
    tpu.vector_store %arg6[%c0_11, %c0_12], %14 {strides = array<i32>} : memref<4x32xf32, #tpu.memory_space<vmem>>, vector<4x32xf32>,
    return
  }
  func.func @transform_0(%arg0: i32) -> (i32, i32) {
    %c0_i32 = arith.constant 0 : i32
    %c0_i32_0 = arith.constant 0 : i32
    %c0_i32_1 = arith.constant 0 : i32
    return %c0_i32, %c0_i32_0 : i32, i32
  }
  func.func @transform_1(%arg0: i32) -> (i32, i32) {
    %c0_i32 = arith.constant 0 : i32
    %c0_i32_0 = arith.constant 0 : i32
    %c0_i32_1 = arith.constant 0 : i32
    return %c0_i32, %c0_i32_0 : i32, i32
  }
  func.func @transform_2(%arg0: i32) -> (i32, i32) {
    %c0_i32 = arith.constant 0 : i32
    %c0_i32_0 = arith.constant 0 : i32
    %c0_i32_1 = arith.constant 0 : i32
    return %c0_i32, %c0_i32_0 : i32, i32
  }
  func.func @transform_3(%arg0: i32) -> (i32, i32) {
    %c0_i32 = arith.constant 0 : i32
    %c0_i32_0 = arith.constant 0 : i32
    %c0_i32_1 = arith.constant 0 : i32
    return %c0_i32, %c0_i32_0 : i32, i32
  }
  func.func @transform_4(%arg0: i32) -> (i32, i32) {
    %c0_i32 = arith.constant 0 : i32
    %c0_i32_0 = arith.constant 0 : i32
    %c0_i32_1 = arith.constant 0 : i32
    return %c0_i32, %c0_i32_0 : i32, i32
  }
  func.func @transform_5(%arg0: i32) -> (i32, i32) {
    %c0_i32 = arith.constant 0 : i32
    %c0_i32_0 = arith.constant 0 : i32
    %c0_i32_1 = arith.constant 0 : i32
    return %c0_i32, %c0_i32_0 : i32, i32
  }
}

module attributes {stable_mosaic.version = 11 : i64} {
  func.func @_fused_ae_kernel(%arg0: i32, %arg1: memref<1x17x4xf32, #tpu.memory_space<vmem>>, %arg2: memref<1x1x32xf32, #tpu.memory_space<vmem>>, %arg3: memref<1x1x32xf32, #tpu.memory_space<vmem>>, %arg4: memref<8x32xbf16, #tpu.memory_space<vmem>>, %arg5: memref<1x32xf32, #tpu.memory_space<vmem>>, %arg6: memref<32x64xbf16, #tpu.memory_space<vmem>>, %arg7: memref<1x64xf32, #tpu.memory_space<vmem>>, %arg8: memref<32x32xbf16, #tpu.memory_space<vmem>>, %arg9: memref<1x32xf32, #tpu.memory_space<vmem>>, %arg10: memref<32x32xbf16, #tpu.memory_space<vmem>>, %arg11: memref<1x32xf32, #tpu.memory_space<vmem>>, %arg12: memref<32x96xbf16, #tpu.memory_space<vmem>>, %arg13: memref<1x96xf32, #tpu.memory_space<vmem>>, %arg14: memref<32x32xbf16, #tpu.memory_space<vmem>>, %arg15: memref<1x32xf32, #tpu.memory_space<vmem>>, %arg16: memref<32x64xbf16, #tpu.memory_space<vmem>>, %arg17: memref<1x64xf32, #tpu.memory_space<vmem>>, %arg18: memref<8x32xbf16, #tpu.memory_space<vmem>>, %arg19: memref<1x8x16xf32, #tpu.memory_space<vmem>>) attributes {dimension_semantics = [#tpu.dimension_semantics<parallel>], iteration_bounds = array<i64: 2>, scalar_prefetch = 0 : i64, scratch_operands = 0 : i64, tpu.core_type = #tpu.core_type<tc>, window_params = [{transform_indices = @transform_0, window_bounds = array<i64: 1, 17, 4>}, {transform_indices = @transform_1, window_bounds = array<i64: 1, 1, 32>}, {transform_indices = @transform_2, window_bounds = array<i64: 1, 1, 32>}, {pipeline_mode = #tpu.pipeline_mode<synchronous>, transform_indices = @transform_3, window_bounds = array<i64: 8, 32>}, {pipeline_mode = #tpu.pipeline_mode<synchronous>, transform_indices = @transform_4, window_bounds = array<i64: 1, 32>}, {pipeline_mode = #tpu.pipeline_mode<synchronous>, transform_indices = @transform_5, window_bounds = array<i64: 32, 64>}, {pipeline_mode = #tpu.pipeline_mode<synchronous>, transform_indices = @transform_6, window_bounds = array<i64: 1, 64>}, {pipeline_mode = #tpu.pipeline_mode<synchronous>, transform_indices = @transform_7, window_bounds = array<i64: 32, 32>}, {pipeline_mode = #tpu.pipeline_mode<synchronous>, transform_indices = @transform_8, window_bounds = array<i64: 1, 32>}, {pipeline_mode = #tpu.pipeline_mode<synchronous>, transform_indices = @transform_9, window_bounds = array<i64: 32, 32>}, {pipeline_mode = #tpu.pipeline_mode<synchronous>, transform_indices = @transform_10, window_bounds = array<i64: 1, 32>}, {pipeline_mode = #tpu.pipeline_mode<synchronous>, transform_indices = @transform_11, window_bounds = array<i64: 32, 96>}, {pipeline_mode = #tpu.pipeline_mode<synchronous>, transform_indices = @transform_12, window_bounds = array<i64: 1, 96>}, {pipeline_mode = #tpu.pipeline_mode<synchronous>, transform_indices = @transform_13, window_bounds = array<i64: 32, 32>}, {pipeline_mode = #tpu.pipeline_mode<synchronous>, transform_indices = @transform_14, window_bounds = array<i64: 1, 32>}, {pipeline_mode = #tpu.pipeline_mode<synchronous>, transform_indices = @transform_15, window_bounds = array<i64: 32, 64>}, {pipeline_mode = #tpu.pipeline_mode<synchronous>, transform_indices = @transform_16, window_bounds = array<i64: 1, 64>}, {pipeline_mode = #tpu.pipeline_mode<synchronous>, transform_indices = @transform_17, window_bounds = array<i64: 8, 32>}, {transform_indices = @transform_18, window_bounds = array<i64: 1, 8, 16>}]} {
    %c0 = arith.constant 0 : index
    %c0_0 = arith.constant 0 : index
    %c0_1 = arith.constant 0 : index
    %0 = vector.load %arg1[%c0, %c0_0, %c0_1] : memref<1x17x4xf32, #tpu.memory_space<vmem>>, vector<1x17x4xf32>
    %1 = vector.shape_cast %0 : vector<1x17x4xf32> to vector<17x4xf32>
    %2 = vector.extract_strided_slice %1 {offsets = [0, 0], sizes = [16, 4], strides = [1, 1]} : vector<17x4xf32> to vector<16x4xf32>
    %3 = vector.extract_strided_slice %1 {offsets = [1, 0], sizes = [16, 4], strides = [1, 1]} : vector<17x4xf32> to vector<16x4xf32>
    %4 = tpu.concatenate %2, %3 in 1 : vector<16x4xf32>, vector<16x4xf32> -> vector<16x8xf32>
    %5 = arith.truncf %4 : vector<16x8xf32> to vector<16x8xbf16>
    %c0_2 = arith.constant 0 : index
    %c0_3 = arith.constant 0 : index
    %6 = vector.load %arg4[%c0_2, %c0_3] : memref<8x32xbf16, #tpu.memory_space<vmem>>, vector<8x32xbf16>
    %cst = arith.constant dense<0.000000e+00> : vector<16x32xf32>
    %7 = tpu.matmul %5, %6, %cst {dimension_numbers = #tpu.dot_dimension_numbers<[1], [0], [0], [1], [0, 0, 1, 1], [], []>} : vector<16x8xbf16>, vector<8x32xbf16>, vector<16x32xf32> -> vector<16x32xf32>
    %c0_4 = arith.constant 0 : index
    %c0_5 = arith.constant 0 : index
    %8 = vector.load %arg5[%c0_4, %c0_5] : memref<1x32xf32, #tpu.memory_space<vmem>>, vector<1x32xf32>
    %9 = vector.broadcast %8 : vector<1x32xf32> to vector<16x32xf32>
    %10 = arith.addf %7, %9 : vector<16x32xf32>
    %cst_6 = arith.constant 0.000000e+00 : f32
    %11 = vector.broadcast %cst_6 : f32 to vector<16x32xf32>
    %12 = arith.maximumf %10, %11 : vector<16x32xf32>
    %13 = arith.truncf %12 : vector<16x32xf32> to vector<16x32xbf16>
    %c0_7 = arith.constant 0 : index
    %c0_8 = arith.constant 0 : index
    %14 = vector.load %arg6[%c0_7, %c0_8] : memref<32x64xbf16, #tpu.memory_space<vmem>>, vector<32x64xbf16>
    %cst_9 = arith.constant dense<0.000000e+00> : vector<16x64xf32>
    %15 = tpu.matmul %13, %14, %cst_9 {dimension_numbers = #tpu.dot_dimension_numbers<[1], [0], [0], [1], [0, 0, 1, 1], [], []>} : vector<16x32xbf16>, vector<32x64xbf16>, vector<16x64xf32> -> vector<16x64xf32>
    %c0_10 = arith.constant 0 : index
    %c0_11 = arith.constant 0 : index
    %16 = vector.load %arg7[%c0_10, %c0_11] : memref<1x64xf32, #tpu.memory_space<vmem>>, vector<1x64xf32>
    %17 = vector.broadcast %16 : vector<1x64xf32> to vector<16x64xf32>
    %18 = arith.addf %15, %17 : vector<16x64xf32>
    %19 = vector.extract_strided_slice %18 {offsets = [0, 0], sizes = [16, 32], strides = [1, 1]} : vector<16x64xf32> to vector<16x32xf32>
    %20 = vector.extract_strided_slice %18 {offsets = [0, 32], sizes = [16, 32], strides = [1, 1]} : vector<16x64xf32> to vector<16x32xf32>
    %21 = arith.negf %20 : vector<16x32xf32>
    %22 = math.exp %21 : vector<16x32xf32>
    %cst_12 = arith.constant 1.000000e+00 : f32
    %23 = vector.broadcast %cst_12 : f32 to vector<16x32xf32>
    %24 = arith.addf %23, %22 : vector<16x32xf32>
    %25 = arith.divf %23, %24 : vector<16x32xf32>
    %26 = arith.mulf %19, %25 : vector<16x32xf32>
    %c0_13 = arith.constant 0 : index
    %c0_14 = arith.constant 0 : index
    %c0_15 = arith.constant 0 : index
    %27 = vector.load %arg2[%c0_13, %c0_14, %c0_15] : memref<1x1x32xf32, #tpu.memory_space<vmem>>, vector<1x1x32xf32>
    %28 = vector.shape_cast %27 : vector<1x1x32xf32> to vector<1x32xf32>
    %29 = arith.truncf %28 : vector<1x32xf32> to vector<1x32xbf16>
    %c0_16 = arith.constant 0 : index
    %c0_17 = arith.constant 0 : index
    %30 = vector.load %arg8[%c0_16, %c0_17] : memref<32x32xbf16, #tpu.memory_space<vmem>>, vector<32x32xbf16>
    %cst_18 = arith.constant dense<0.000000e+00> : vector<1x32xf32>
    %31 = tpu.matmul %29, %30, %cst_18 {dimension_numbers = #tpu.dot_dimension_numbers<[1], [0], [0], [1], [0, 0, 1, 1], [], []>} : vector<1x32xbf16>, vector<32x32xbf16>, vector<1x32xf32> -> vector<1x32xf32>
    %c0_19 = arith.constant 0 : index
    %c0_20 = arith.constant 0 : index
    %32 = vector.load %arg9[%c0_19, %c0_20] : memref<1x32xf32, #tpu.memory_space<vmem>>, vector<1x32xf32>
    %33 = arith.addf %31, %32 : vector<1x32xf32>
    %c0_21 = arith.constant 0 : index
    %c0_22 = arith.constant 0 : index
    %c0_23 = arith.constant 0 : index
    %34 = vector.load %arg3[%c0_21, %c0_22, %c0_23] : memref<1x1x32xf32, #tpu.memory_space<vmem>>, vector<1x1x32xf32>
    %35 = vector.shape_cast %34 : vector<1x1x32xf32> to vector<1x32xf32>
    %36 = arith.truncf %35 : vector<1x32xf32> to vector<1x32xbf16>
    %c0_24 = arith.constant 0 : index
    %c0_25 = arith.constant 0 : index
    %37 = vector.load %arg10[%c0_24, %c0_25] : memref<32x32xbf16, #tpu.memory_space<vmem>>, vector<32x32xbf16>
    %cst_26 = arith.constant dense<0.000000e+00> : vector<1x32xf32>
    %38 = tpu.matmul %36, %37, %cst_26 {dimension_numbers = #tpu.dot_dimension_numbers<[1], [0], [0], [1], [0, 0, 1, 1], [], []>} : vector<1x32xbf16>, vector<32x32xbf16>, vector<1x32xf32> -> vector<1x32xf32>
    %c0_27 = arith.constant 0 : index
    %c0_28 = arith.constant 0 : index
    %39 = vector.load %arg11[%c0_27, %c0_28] : memref<1x32xf32, #tpu.memory_space<vmem>>, vector<1x32xf32>
    %40 = arith.addf %38, %39 : vector<1x32xf32>
    %cst_29 = arith.constant 0.000000e+00 : f32
    %41 = vector.broadcast %cst_29 : f32 to vector<1x32xf32>
    %42 = arith.maximumf %40, %41 : vector<1x32xf32>
    %43 = vector.broadcast %33 : vector<1x32xf32> to vector<16x32xf32>
    %44 = arith.addf %26, %43 : vector<16x32xf32>
    %45 = vector.broadcast %42 : vector<1x32xf32> to vector<16x32xf32>
    %46 = arith.addf %44, %45 : vector<16x32xf32>
    %47 = arith.truncf %46 : vector<16x32xf32> to vector<16x32xbf16>
    %c0_30 = arith.constant 0 : index
    %c0_31 = arith.constant 0 : index
    %48 = vector.load %arg12[%c0_30, %c0_31] : memref<32x96xbf16, #tpu.memory_space<vmem>>, vector<32x96xbf16>
    %cst_32 = arith.constant dense<0.000000e+00> : vector<16x96xf32>
    %49 = tpu.matmul %47, %48, %cst_32 {dimension_numbers = #tpu.dot_dimension_numbers<[1], [0], [0], [1], [0, 0, 1, 1], [], []>} : vector<16x32xbf16>, vector<32x96xbf16>, vector<16x96xf32> -> vector<16x96xf32>
    %c0_33 = arith.constant 0 : index
    %c0_34 = arith.constant 0 : index
    %50 = vector.load %arg13[%c0_33, %c0_34] : memref<1x96xf32, #tpu.memory_space<vmem>>, vector<1x96xf32>
    %51 = vector.broadcast %50 : vector<1x96xf32> to vector<16x96xf32>
    %52 = arith.addf %49, %51 : vector<16x96xf32>
    %53 = vector.extract_strided_slice %52 {offsets = [0, 0], sizes = [16, 32], strides = [1, 1]} : vector<16x96xf32> to vector<16x32xf32>
    %54 = vector.extract_strided_slice %52 {offsets = [0, 32], sizes = [16, 32], strides = [1, 1]} : vector<16x96xf32> to vector<16x32xf32>
    %55 = vector.extract_strided_slice %52 {offsets = [0, 64], sizes = [16, 32], strides = [1, 1]} : vector<16x96xf32> to vector<16x32xf32>
    %56 = vector.extract_strided_slice %53 {offsets = [0, 0], sizes = [16, 8], strides = [1, 1]} : vector<16x32xf32> to vector<16x8xf32>
    %57 = arith.truncf %56 : vector<16x8xf32> to vector<16x8xbf16>
    %58 = vector.extract_strided_slice %54 {offsets = [0, 0], sizes = [16, 8], strides = [1, 1]} : vector<16x32xf32> to vector<16x8xf32>
    %59 = arith.truncf %58 : vector<16x8xf32> to vector<16x8xbf16>
    %60 = vector.extract_strided_slice %55 {offsets = [0, 0], sizes = [16, 8], strides = [1, 1]} : vector<16x32xf32> to vector<16x8xf32>
    %61 = arith.truncf %60 : vector<16x8xf32> to vector<16x8xbf16>
    %cst_35 = arith.constant dense<0.000000e+00> : vector<16x16xf32>
    %62 = tpu.matmul %57, %59, %cst_35 {dimension_numbers = #tpu.dot_dimension_numbers<[1], [1], [0], [0], [0, 0, 1, 0], [], []>} : vector<16x8xbf16>, vector<16x8xbf16>, vector<16x16xf32> -> vector<16x16xf32>
    %cst_36 = arith.constant 0.353553385 : f32
    %63 = vector.broadcast %cst_36 : f32 to vector<16x16xf32>
    %64 = arith.mulf %62, %63 : vector<16x16xf32>
    %cst_37 = arith.constant dense<0xFF800000> : vector<16xf32>
    %65 = vector.multi_reduction <maximumf>, %64, %cst_37 [1] : vector<16x16xf32> to vector<16xf32>
    %66 = vector.shape_cast %65 : vector<16xf32> to vector<16x1xf32>
    %67 = vector.broadcast %66 : vector<16x1xf32> to vector<16x16xf32>
    %68 = arith.subf %64, %67 : vector<16x16xf32>
    %69 = math.exp %68 : vector<16x16xf32>
    %cst_38 = arith.constant dense<0.000000e+00> : vector<16xf32>
    %70 = vector.multi_reduction <add>, %69, %cst_38 [1] : vector<16x16xf32> to vector<16xf32>
    %71 = vector.shape_cast %70 : vector<16xf32> to vector<16x1xf32>
    %72 = tpu.reciprocal %71 {approx = true} : vector<16x1xf32> -> vector<16x1xf32>
    %73 = vector.broadcast %72 : vector<16x1xf32> to vector<16x16xf32>
    %74 = arith.mulf %69, %73 : vector<16x16xf32>
    %75 = arith.truncf %74 : vector<16x16xf32> to vector<16x16xbf16>
    %cst_39 = arith.constant dense<0.000000e+00> : vector<16x8xf32>
    %76 = tpu.matmul %75, %61, %cst_39 {dimension_numbers = #tpu.dot_dimension_numbers<[1], [0], [0], [1], [0, 0, 1, 1], [], []>} : vector<16x16xbf16>, vector<16x8xbf16>, vector<16x8xf32> -> vector<16x8xf32>
    %77 = vector.extract_strided_slice %53 {offsets = [0, 8], sizes = [16, 8], strides = [1, 1]} : vector<16x32xf32> to vector<16x8xf32>
    %78 = arith.truncf %77 : vector<16x8xf32> to vector<16x8xbf16>
    %79 = vector.extract_strided_slice %54 {offsets = [0, 8], sizes = [16, 8], strides = [1, 1]} : vector<16x32xf32> to vector<16x8xf32>
    %80 = arith.truncf %79 : vector<16x8xf32> to vector<16x8xbf16>
    %81 = vector.extract_strided_slice %55 {offsets = [0, 8], sizes = [16, 8], strides = [1, 1]} : vector<16x32xf32> to vector<16x8xf32>
    %82 = arith.truncf %81 : vector<16x8xf32> to vector<16x8xbf16>
    %cst_40 = arith.constant dense<0.000000e+00> : vector<16x16xf32>
    %83 = tpu.matmul %78, %80, %cst_40 {dimension_numbers = #tpu.dot_dimension_numbers<[1], [1], [0], [0], [0, 0, 1, 0], [], []>} : vector<16x8xbf16>, vector<16x8xbf16>, vector<16x16xf32> -> vector<16x16xf32>
    %cst_41 = arith.constant 0.353553385 : f32
    %84 = vector.broadcast %cst_41 : f32 to vector<16x16xf32>
    %85 = arith.mulf %83, %84 : vector<16x16xf32>
    %cst_42 = arith.constant dense<0xFF800000> : vector<16xf32>
    %86 = vector.multi_reduction <maximumf>, %85, %cst_42 [1] : vector<16x16xf32> to vector<16xf32>
    %87 = vector.shape_cast %86 : vector<16xf32> to vector<16x1xf32>
    %88 = vector.broadcast %87 : vector<16x1xf32> to vector<16x16xf32>
    %89 = arith.subf %85, %88 : vector<16x16xf32>
    %90 = math.exp %89 : vector<16x16xf32>
    %cst_43 = arith.constant dense<0.000000e+00> : vector<16xf32>
    %91 = vector.multi_reduction <add>, %90, %cst_43 [1] : vector<16x16xf32> to vector<16xf32>
    %92 = vector.shape_cast %91 : vector<16xf32> to vector<16x1xf32>
    %93 = tpu.reciprocal %92 {approx = true} : vector<16x1xf32> -> vector<16x1xf32>
    %94 = vector.broadcast %93 : vector<16x1xf32> to vector<16x16xf32>
    %95 = arith.mulf %90, %94 : vector<16x16xf32>
    %96 = arith.truncf %95 : vector<16x16xf32> to vector<16x16xbf16>
    %cst_44 = arith.constant dense<0.000000e+00> : vector<16x8xf32>
    %97 = tpu.matmul %96, %82, %cst_44 {dimension_numbers = #tpu.dot_dimension_numbers<[1], [0], [0], [1], [0, 0, 1, 1], [], []>} : vector<16x16xbf16>, vector<16x8xbf16>, vector<16x8xf32> -> vector<16x8xf32>
    %98 = vector.extract_strided_slice %53 {offsets = [0, 16], sizes = [16, 8], strides = [1, 1]} : vector<16x32xf32> to vector<16x8xf32>
    %99 = arith.truncf %98 : vector<16x8xf32> to vector<16x8xbf16>
    %100 = vector.extract_strided_slice %54 {offsets = [0, 16], sizes = [16, 8], strides = [1, 1]} : vector<16x32xf32> to vector<16x8xf32>
    %101 = arith.truncf %100 : vector<16x8xf32> to vector<16x8xbf16>
    %102 = vector.extract_strided_slice %55 {offsets = [0, 16], sizes = [16, 8], strides = [1, 1]} : vector<16x32xf32> to vector<16x8xf32>
    %103 = arith.truncf %102 : vector<16x8xf32> to vector<16x8xbf16>
    %cst_45 = arith.constant dense<0.000000e+00> : vector<16x16xf32>
    %104 = tpu.matmul %99, %101, %cst_45 {dimension_numbers = #tpu.dot_dimension_numbers<[1], [1], [0], [0], [0, 0, 1, 0], [], []>} : vector<16x8xbf16>, vector<16x8xbf16>, vector<16x16xf32> -> vector<16x16xf32>
    %cst_46 = arith.constant 0.353553385 : f32
    %105 = vector.broadcast %cst_46 : f32 to vector<16x16xf32>
    %106 = arith.mulf %104, %105 : vector<16x16xf32>
    %cst_47 = arith.constant dense<0xFF800000> : vector<16xf32>
    %107 = vector.multi_reduction <maximumf>, %106, %cst_47 [1] : vector<16x16xf32> to vector<16xf32>
    %108 = vector.shape_cast %107 : vector<16xf32> to vector<16x1xf32>
    %109 = vector.broadcast %108 : vector<16x1xf32> to vector<16x16xf32>
    %110 = arith.subf %106, %109 : vector<16x16xf32>
    %111 = math.exp %110 : vector<16x16xf32>
    %cst_48 = arith.constant dense<0.000000e+00> : vector<16xf32>
    %112 = vector.multi_reduction <add>, %111, %cst_48 [1] : vector<16x16xf32> to vector<16xf32>
    %113 = vector.shape_cast %112 : vector<16xf32> to vector<16x1xf32>
    %114 = tpu.reciprocal %113 {approx = true} : vector<16x1xf32> -> vector<16x1xf32>
    %115 = vector.broadcast %114 : vector<16x1xf32> to vector<16x16xf32>
    %116 = arith.mulf %111, %115 : vector<16x16xf32>
    %117 = arith.truncf %116 : vector<16x16xf32> to vector<16x16xbf16>
    %cst_49 = arith.constant dense<0.000000e+00> : vector<16x8xf32>
    %118 = tpu.matmul %117, %103, %cst_49 {dimension_numbers = #tpu.dot_dimension_numbers<[1], [0], [0], [1], [0, 0, 1, 1], [], []>} : vector<16x16xbf16>, vector<16x8xbf16>, vector<16x8xf32> -> vector<16x8xf32>
    %119 = vector.extract_strided_slice %53 {offsets = [0, 24], sizes = [16, 8], strides = [1, 1]} : vector<16x32xf32> to vector<16x8xf32>
    %120 = arith.truncf %119 : vector<16x8xf32> to vector<16x8xbf16>
    %121 = vector.extract_strided_slice %54 {offsets = [0, 24], sizes = [16, 8], strides = [1, 1]} : vector<16x32xf32> to vector<16x8xf32>
    %122 = arith.truncf %121 : vector<16x8xf32> to vector<16x8xbf16>
    %123 = vector.extract_strided_slice %55 {offsets = [0, 24], sizes = [16, 8], strides = [1, 1]} : vector<16x32xf32> to vector<16x8xf32>
    %124 = arith.truncf %123 : vector<16x8xf32> to vector<16x8xbf16>
    %cst_50 = arith.constant dense<0.000000e+00> : vector<16x16xf32>
    %125 = tpu.matmul %120, %122, %cst_50 {dimension_numbers = #tpu.dot_dimension_numbers<[1], [1], [0], [0], [0, 0, 1, 0], [], []>} : vector<16x8xbf16>, vector<16x8xbf16>, vector<16x16xf32> -> vector<16x16xf32>
    %cst_51 = arith.constant 0.353553385 : f32
    %126 = vector.broadcast %cst_51 : f32 to vector<16x16xf32>
    %127 = arith.mulf %125, %126 : vector<16x16xf32>
    %cst_52 = arith.constant dense<0xFF800000> : vector<16xf32>
    %128 = vector.multi_reduction <maximumf>, %127, %cst_52 [1] : vector<16x16xf32> to vector<16xf32>
    %129 = vector.shape_cast %128 : vector<16xf32> to vector<16x1xf32>
    %130 = vector.broadcast %129 : vector<16x1xf32> to vector<16x16xf32>
    %131 = arith.subf %127, %130 : vector<16x16xf32>
    %132 = math.exp %131 : vector<16x16xf32>
    %cst_53 = arith.constant dense<0.000000e+00> : vector<16xf32>
    %133 = vector.multi_reduction <add>, %132, %cst_53 [1] : vector<16x16xf32> to vector<16xf32>
    %134 = vector.shape_cast %133 : vector<16xf32> to vector<16x1xf32>
    %135 = tpu.reciprocal %134 {approx = true} : vector<16x1xf32> -> vector<16x1xf32>
    %136 = vector.broadcast %135 : vector<16x1xf32> to vector<16x16xf32>
    %137 = arith.mulf %132, %136 : vector<16x16xf32>
    %138 = arith.truncf %137 : vector<16x16xf32> to vector<16x16xbf16>
    %cst_54 = arith.constant dense<0.000000e+00> : vector<16x8xf32>
    %139 = tpu.matmul %138, %124, %cst_54 {dimension_numbers = #tpu.dot_dimension_numbers<[1], [0], [0], [1], [0, 0, 1, 1], [], []>} : vector<16x16xbf16>, vector<16x8xbf16>, vector<16x8xf32> -> vector<16x8xf32>
    %140 = tpu.concatenate %76, %97, %118, %139 in 1 : vector<16x8xf32>, vector<16x8xf32>, vector<16x8xf32>, vector<16x8xf32> -> vector<16x32xf32>
    %141 = arith.truncf %140 : vector<16x32xf32> to vector<16x32xbf16>
    %c0_55 = arith.constant 0 : index
    %c0_56 = arith.constant 0 : index
    %142 = vector.load %arg14[%c0_55, %c0_56] : memref<32x32xbf16, #tpu.memory_space<vmem>>, vector<32x32xbf16>
    %cst_57 = arith.constant dense<0.000000e+00> : vector<16x32xf32>
    %143 = tpu.matmul %141, %142, %cst_57 {dimension_numbers = #tpu.dot_dimension_numbers<[1], [0], [0], [1], [0, 0, 1, 1], [], []>} : vector<16x32xbf16>, vector<32x32xbf16>, vector<16x32xf32> -> vector<16x32xf32>
    %144 = arith.addf %46, %143 : vector<16x32xf32>
    %c0_58 = arith.constant 0 : index
    %c0_59 = arith.constant 0 : index
    %145 = vector.load %arg15[%c0_58, %c0_59] : memref<1x32xf32, #tpu.memory_space<vmem>>, vector<1x32xf32>
    %146 = vector.broadcast %145 : vector<1x32xf32> to vector<16x32xf32>
    %147 = arith.addf %144, %146 : vector<16x32xf32>
    %148 = arith.truncf %147 : vector<16x32xf32> to vector<16x32xbf16>
    %c0_60 = arith.constant 0 : index
    %c0_61 = arith.constant 0 : index
    %149 = vector.load %arg16[%c0_60, %c0_61] : memref<32x64xbf16, #tpu.memory_space<vmem>>, vector<32x64xbf16>
    %cst_62 = arith.constant dense<0.000000e+00> : vector<16x64xf32>
    %150 = tpu.matmul %148, %149, %cst_62 {dimension_numbers = #tpu.dot_dimension_numbers<[1], [0], [0], [1], [0, 0, 1, 1], [], []>} : vector<16x32xbf16>, vector<32x64xbf16>, vector<16x64xf32> -> vector<16x64xf32>
    %c0_63 = arith.constant 0 : index
    %c0_64 = arith.constant 0 : index
    %151 = vector.load %arg17[%c0_63, %c0_64] : memref<1x64xf32, #tpu.memory_space<vmem>>, vector<1x64xf32>
    %152 = vector.broadcast %151 : vector<1x64xf32> to vector<16x64xf32>
    %153 = arith.addf %150, %152 : vector<16x64xf32>
    %154 = vector.extract_strided_slice %153 {offsets = [0, 0], sizes = [16, 32], strides = [1, 1]} : vector<16x64xf32> to vector<16x32xf32>
    %155 = vector.extract_strided_slice %153 {offsets = [0, 32], sizes = [16, 32], strides = [1, 1]} : vector<16x64xf32> to vector<16x32xf32>
    %156 = arith.negf %155 : vector<16x32xf32>
    %157 = math.exp %156 : vector<16x32xf32>
    %cst_65 = arith.constant 1.000000e+00 : f32
    %158 = vector.broadcast %cst_65 : f32 to vector<16x32xf32>
    %159 = arith.addf %158, %157 : vector<16x32xf32>
    %160 = arith.divf %158, %159 : vector<16x32xf32>
    %161 = arith.mulf %154, %160 : vector<16x32xf32>
    %c0_66 = arith.constant 0 : index
    %c0_67 = arith.constant 0 : index
    %162 = vector.load %arg18[%c0_66, %c0_67] : memref<8x32xbf16, #tpu.memory_space<vmem>>, vector<8x32xbf16>
    %163 = arith.truncf %161 : vector<16x32xf32> to vector<16x32xbf16>
    %cst_68 = arith.constant dense<0.000000e+00> : vector<8x16xf32>
    %164 = tpu.matmul %162, %163, %cst_68 {dimension_numbers = #tpu.dot_dimension_numbers<[1], [1], [0], [0], [0, 0, 1, 0], [], []>} : vector<8x32xbf16>, vector<16x32xbf16>, vector<8x16xf32> -> vector<8x16xf32>
    %c0_69 = arith.constant 0 : index
    %c0_70 = arith.constant 0 : index
    %c0_71 = arith.constant 0 : index
    %165 = vector.load %arg19[%c0_69, %c0_70, %c0_71] : memref<1x8x16xf32, #tpu.memory_space<vmem>>, vector<1x8x16xf32>
    %166 = vector.shape_cast %165 : vector<1x8x16xf32> to vector<8x16xf32>
    %167 = vector.shape_cast %164 : vector<8x16xf32> to vector<1x8x16xf32>
    tpu.vector_store %arg19[%c0_69, %c0_70, %c0_71], %167 {strides = array<i32>} : memref<1x8x16xf32, #tpu.memory_space<vmem>>, vector<1x8x16xf32>,
    return
  }
  func.func @transform_0(%arg0: i32) -> (i32, i32, i32) {
    %c0_i32 = arith.constant 0 : i32
    %c0_i32_0 = arith.constant 0 : i32
    %c0_i32_1 = arith.constant 0 : i32
    return %arg0, %c0_i32, %c0_i32_0 : i32, i32, i32
  }
  func.func @transform_1(%arg0: i32) -> (i32, i32, i32) {
    %c0_i32 = arith.constant 0 : i32
    %c0_i32_0 = arith.constant 0 : i32
    %c0_i32_1 = arith.constant 0 : i32
    return %arg0, %c0_i32, %c0_i32_0 : i32, i32, i32
  }
  func.func @transform_2(%arg0: i32) -> (i32, i32, i32) {
    %c0_i32 = arith.constant 0 : i32
    %c0_i32_0 = arith.constant 0 : i32
    %c0_i32_1 = arith.constant 0 : i32
    return %arg0, %c0_i32, %c0_i32_0 : i32, i32, i32
  }
  func.func @transform_3(%arg0: i32) -> (i32, i32) {
    %c0_i32 = arith.constant 0 : i32
    %c0_i32_0 = arith.constant 0 : i32
    %c0_i32_1 = arith.constant 0 : i32
    return %c0_i32, %c0_i32_0 : i32, i32
  }
  func.func @transform_4(%arg0: i32) -> (i32, i32) {
    %c0_i32 = arith.constant 0 : i32
    %c0_i32_0 = arith.constant 0 : i32
    %c0_i32_1 = arith.constant 0 : i32
    return %c0_i32, %c0_i32_0 : i32, i32
  }
  func.func @transform_5(%arg0: i32) -> (i32, i32) {
    %c0_i32 = arith.constant 0 : i32
    %c0_i32_0 = arith.constant 0 : i32
    %c0_i32_1 = arith.constant 0 : i32
    return %c0_i32, %c0_i32_0 : i32, i32
  }
  func.func @transform_6(%arg0: i32) -> (i32, i32) {
    %c0_i32 = arith.constant 0 : i32
    %c0_i32_0 = arith.constant 0 : i32
    %c0_i32_1 = arith.constant 0 : i32
    return %c0_i32, %c0_i32_0 : i32, i32
  }
  func.func @transform_7(%arg0: i32) -> (i32, i32) {
    %c0_i32 = arith.constant 0 : i32
    %c0_i32_0 = arith.constant 0 : i32
    %c0_i32_1 = arith.constant 0 : i32
    return %c0_i32, %c0_i32_0 : i32, i32
  }
  func.func @transform_8(%arg0: i32) -> (i32, i32) {
    %c0_i32 = arith.constant 0 : i32
    %c0_i32_0 = arith.constant 0 : i32
    %c0_i32_1 = arith.constant 0 : i32
    return %c0_i32, %c0_i32_0 : i32, i32
  }
  func.func @transform_9(%arg0: i32) -> (i32, i32) {
    %c0_i32 = arith.constant 0 : i32
    %c0_i32_0 = arith.constant 0 : i32
    %c0_i32_1 = arith.constant 0 : i32
    return %c0_i32, %c0_i32_0 : i32, i32
  }
  func.func @transform_10(%arg0: i32) -> (i32, i32) {
    %c0_i32 = arith.constant 0 : i32
    %c0_i32_0 = arith.constant 0 : i32
    %c0_i32_1 = arith.constant 0 : i32
    return %c0_i32, %c0_i32_0 : i32, i32
  }
  func.func @transform_11(%arg0: i32) -> (i32, i32) {
    %c0_i32 = arith.constant 0 : i32
    %c0_i32_0 = arith.constant 0 : i32
    %c0_i32_1 = arith.constant 0 : i32
    return %c0_i32, %c0_i32_0 : i32, i32
  }
  func.func @transform_12(%arg0: i32) -> (i32, i32) {
    %c0_i32 = arith.constant 0 : i32
    %c0_i32_0 = arith.constant 0 : i32
    %c0_i32_1 = arith.constant 0 : i32
    return %c0_i32, %c0_i32_0 : i32, i32
  }
  func.func @transform_13(%arg0: i32) -> (i32, i32) {
    %c0_i32 = arith.constant 0 : i32
    %c0_i32_0 = arith.constant 0 : i32
    %c0_i32_1 = arith.constant 0 : i32
    return %c0_i32, %c0_i32_0 : i32, i32
  }
  func.func @transform_14(%arg0: i32) -> (i32, i32) {
    %c0_i32 = arith.constant 0 : i32
    %c0_i32_0 = arith.constant 0 : i32
    %c0_i32_1 = arith.constant 0 : i32
    return %c0_i32, %c0_i32_0 : i32, i32
  }
  func.func @transform_15(%arg0: i32) -> (i32, i32) {
    %c0_i32 = arith.constant 0 : i32
    %c0_i32_0 = arith.constant 0 : i32
    %c0_i32_1 = arith.constant 0 : i32
    return %c0_i32, %c0_i32_0 : i32, i32
  }
  func.func @transform_16(%arg0: i32) -> (i32, i32) {
    %c0_i32 = arith.constant 0 : i32
    %c0_i32_0 = arith.constant 0 : i32
    %c0_i32_1 = arith.constant 0 : i32
    return %c0_i32, %c0_i32_0 : i32, i32
  }
  func.func @transform_17(%arg0: i32) -> (i32, i32) {
    %c0_i32 = arith.constant 0 : i32
    %c0_i32_0 = arith.constant 0 : i32
    %c0_i32_1 = arith.constant 0 : i32
    return %c0_i32, %c0_i32_0 : i32, i32
  }
  func.func @transform_18(%arg0: i32) -> (i32, i32, i32) {
    %c0_i32 = arith.constant 0 : i32
    %c0_i32_0 = arith.constant 0 : i32
    %c0_i32_1 = arith.constant 0 : i32
    return %arg0, %c0_i32, %c0_i32_0 : i32, i32, i32
  }
}

</mosaic_0001>

<bundles_post_ra>
// kernel: voiceformer_vem.2
= control target key start
LH: loop header
LB: loop body
LE: loop exit
PB: predicated region body
PF: predicated region fallthrough
CT: control target
= control target key end

     0   :  { %vm70_vm0 = vcmask 1041408   ;;  %v266_v0 = vmov 0.0   ;;  %vm267_vm1 = vmmov 0   ;;  %vm66_vm2 = vcmask 556032   ;;  %s337_s1 = inlined_call_operand.vmem [shape: bf16[68,64], index: 1, kind: input, shape index: {}]   ;;  %s338_s3 = inlined_call_operand.vmem [shape: bf16[64,32], index: 3, kind: input, shape index: {}]   ;;  %s339_s0 = inlined_call_operand.vmem [shape: f32[4,68], index: 0, kind: input, shape index: {}]   ;;  %s340_s2 = inlined_call_operand.vmem [shape: f32[1,64], index: 2, kind: input, shape index: {}]   ;;  %s341_s4 = inlined_call_operand.vmem [shape: f32[1,32], index: 4, kind: input, shape index: {}]   ;;  %s342_s5 = inlined_call_operand.vmem [shape: f32[4,32], index: 5, kind: output, shape index: {}]  }
   0x1   :  { %229 = vmatprep.subr.bf16.mxu0 %v266_v0  ;;  %v257_v1 = vld [vmem:[%s337_s1 + $0x20] ss:$0 sps:$4 sm:$0x33]   ;;  %239 = vmatprep.mubr.msk.bf16.mxu0 %vm267_vm1, %v266_v0  ;;  %v258_v3 = vld [vmem:[%s337_s1 + $0x18] sm:$0xff]   ;;  %v259_v5 = vld [vmem:[%s337_s1 + $0x10] sm:$0xff]   ;;  %vm155_vm3 = vcmask 523264  }
   0x2   :  { %243 = vmatprep.subr.bf16.mxu1 %v266_v0  ;;  %251 = vmatprep.mubr.msk.bf16.mxu1 %vm267_vm1, %v266_v0  ;;  %v72_v2 = vsel %vm70_vm0, %v257_v1, 0  ;;  %v262_v4 = vld [vmem:[%s338_s3 + $0x18] sm:$0xff]   ;;  %v263_v6 = vld [vmem:[%s338_s3 + $0x10] sm:$0xff]   ;;  %v260_v7 = vld [vmem:[%s337_s1 + $0x8] sm:$0xff]   ;;  %vm199_vm4 = vcmask 257024  }
   0x3   :  { %230 = vmatpush3.bf16.msra.mxu0 %v72_v2  ;;  %244 = vmatpush3.bf16.msra.mxu1 %v262_v4  ;;  %v261_v8 = vld [vmem:[%s337_s1] sm:$0xff]   ;;  %v264_v11 = vld [vmem:[%s338_s3 + $0x8] sm:$0xff]  }
   0x4   :  { %231 = vmatprep.subr.bf16.mxu0 %v266_v0  ;;  %245 = vmatprep.subr.bf16.mxu1 %v266_v0  ;;  %v21_v9 = vld [vmem:[%s339_s0] sm:$0xf] }
   0x5   :  { %v22_v10 = vpack.c.bf16 %v21_v9, %v21_v9  ;;  %v265_v12 = vld [vmem:[%s338_s3] sm:$0xff]  }
   0x6   :  { %v205_v13 = vld [vmem:[%s340_s2] ss:$0 sm:$0xff] }
   0x7   :  { %232 = vmatpush3.bf16.msra.mxu0 %v258_v3  ;;  %246 = vmatpush3.bf16.msra.mxu1 %v263_v6  ;;  %v212_v21 = vld [vmem:[%s341_s4] ss:$0 sm:$0xff] }
   0x8   :  { %233 = vmatprep.subr.bf16.mxu0 %v266_v0  ;;  %247 = vmatprep.subr.bf16.mxu1 %v266_v0 }
   0xb   :  { %234 = vmatpush3.bf16.msra.mxu0 %v259_v5  ;;  %248 = vmatpush3.bf16.msra.mxu1 %v264_v11 }
   0xc   :  { %235 = vmatprep.subr.bf16.mxu0 %v266_v0  ;;  %249 = vmatprep.subr.bf16.mxu1 %v266_v0 }
   0xf   :  { %236 = vmatpush3.bf16.msra.mxu0 %v260_v7  ;;  %250 = vmatpush3.bf16.msra.mxu1 %v265_v12 }
  0x10   :  { %237 = vmatprep.subr.bf16.mxu0 %v266_v0 }
  0x13   :  { %238 = vmatpush3.bf16.msra.mxu0 %v261_v8 }
  0x16   :  { %240 = vmatmul.mubr.msk.bf16.vlgmr.msra.gmra.mxu0 %vm66_vm2, %v22_v10 }
  0xd6   :  { %v108_v14 = vpop.f32.mrf.mxu0 }
  0xd7   :  { %v109_v15 = vadd.f32 %v205_v13, %v108_v14 }
  0xd8   :  { %v241_v16 = vpop.f32.mrf.mxu0 }
  0xd9   :  { %v114_v17 = vmax.f32 %v109_v15, 0.0 }
  0xda   :  { %v111_v18 = vpop.f32.mrf.mxu0 }
  0xdb   :  { %v115_v19 = vpack.c.bf16 %v114_v17, %v114_v17 }
  0xdc   :  { %v242_v20 = vpop.f32.mrf.mxu0 }
  0xdd   :  { %252 = vmatmul.mubr.msk.bf16.vlgmr.msra.gmra.mxu1 %vm155_vm3, %v115_v19 }
 0x19d   :  { %v193_v22 = vpop.f32.mrf.mxu1 }
 0x19e   :  { %v194_v23 = vadd.f32 %v212_v21, %v193_v22 }
 0x19f   :  { %v253_v24 = vpop.f32.mrf.mxu1 }
 0x1a0   :  { %200 = vst.msk [vmem:[%s342_s5] sm:$0xf] %vm199_vm4, %v194_v23 }
 0x1a1   :  { %v196_v25 = vpop.f32.mrf.mxu1 }
 0x1a3   :  { %v254_v26 = vpop.f32.mrf.mxu1 }

// kernel: voiceformer_vem.3
= control target key start
LH: loop header
LB: loop body
LE: loop exit
PB: predicated region body
PF: predicated region fallthrough
CT: control target
= control target key end

     0   :  { %s2204_s27 = smov 0   ;;  %s2419_s0 = inlined_call_operand.vmem [shape: f32[2,17,4], index: 0, kind: input, shape index: {}]   ;;  %s2420_s1 = inlined_call_operand.vmem [shape: f32[2,1,32], index: 1, kind: input, shape index: {}]   ;;  %s2421_s2 = inlined_call_operand.vmem [shape: f32[2,1,32], index: 2, kind: input, shape index: {}]   ;;  %s2422_s3 = inlined_call_operand.vmem [shape: bf16[8,32], index: 3, kind: input, shape index: {}]   ;;  %s2423_s4 = inlined_call_operand.vmem [shape: f32[1,32], index: 4, kind: input, shape index: {}]   ;;  %s2424_s5 = inlined_call_operand.vmem [shape: bf16[32,64], index: 5, kind: input, shape index: {}]   ;;  %s2425_s6 = inlined_call_operand.vmem [shape: f32[1,64], index: 6, kind: input, shape index: {}]   ;;  %s2426_s7 = inlined_call_operand.vmem [shape: bf16[32,32], index: 7, kind: input, shape index: {}]   ;;  %s2427_s8 = inlined_call_operand.vmem [shape: f32[1,32], index: 8, kind: input, shape index: {}]   ;;  %s2428_s9 = inlined_call_operand.vmem [shape: bf16[32,32], index: 9, kind: input, shape index: {}]   ;;  %s2429_s10 = inlined_call_operand.vmem [shape: f32[1,32], index: 10, kind: input, shape index: {}]   ;;  %s2430_s11 = inlined_call_operand.vmem [shape: bf16[32,96], index: 11, kind: input, shape index: {}]   ;;  %s2431_s12 = inlined_call_operand.vmem [shape: f32[1,96], index: 12, kind: input, shape index: {}]   ;;  %s2432_s13 = inlined_call_operand.vmem [shape: bf16[32,32], index: 13, kind: input, shape index: {}]   ;;  %s2433_s14 = inlined_call_operand.vmem [shape: f32[1,32], index: 14, kind: input, shape index: {}]   ;;  %s2434_s15 = inlined_call_operand.vmem [shape: bf16[32,64], index: 15, kind: input, shape index: {}]   ;;  %s2435_s16 = inlined_call_operand.vmem [shape: f32[1,64], index: 16, kind: input, shape index: {}]   ;;  %s2436_s17 = inlined_call_operand.vmem [shape: bf16[8,32], index: 17, kind: input, shape index: {}]   ;;  %s2437_s18 = inlined_call_operand.vmem [shape: f32[2,8,16], index: 18, kind: output, shape index: {}]  }
   0x1   :  { %2438 = sst [smem:[#allocation2_spill]] %s2419_s0 }
   0x2   :  { %2439 = sst [smem:[#allocation3_spill]] %s2420_s1 }
   0x3   :  { %2440 = sst [smem:[#allocation4_spill]] %s2421_s2 }
   0x4 LB: > { %s1786_s28 = sadd.s32 4294967295, %s2090_s27   ;;  %p1790_p0 = scmp.ge.s32.totalorder %s2090_s27, 1  ;;  %s2090_s27 = sphi %s2204_s27, %s28_s27  }
   0x5   : > { %p528_p1 = scmp.lt.s32.totalorder %s2090_s27, 3 }
   0x7   : > { %p529_p2 = pnand %p1790_p0, %p528_p1 }
   0x8   : > { %p587_p3 = scmp.lt.s32.totalorder (!%p529_p2), %s1786_s28, 1  ;;  %s2441_s20 = sld [smem:[#allocation2_spill]] (!%p529_p2) }
   0x9   : > { %532 = sbr.rel (%p529_p2) target bundleno = 2646 (0xa56), region = 92  ;;  %s2094_s22 = smov (!%p529_p2), 4  }
   0xa   : > { %s2443_s29 = sld [smem:[#allocation4_spill]] (!%p529_p2)  ;;  %s2095_s24 = smov (!%p529_p2), 96  }
   0xb   : > { %s2096_s1 = smov (!%p529_p2), 88   ;;  %s2100_s2 = smov (!%p529_p2), 112  }
   0xc   : > { %s2101_s23 = smov (!%p529_p2), 104   ;;  %s2102_s25 = smov (!%p529_p2), 64  }
   0xd   : > { %s2103_s26 = smov (!%p529_p2), 48  }
   0xe   : > { %vm637_vm0 = vcmask 1043456   ;;  %v2092_v0 = vmov 0.0   ;;  %v625_v1 = vld [vmem:[%s2422_s3] sm:$0xf]  ;;  %s2445_s28 = smov (!%p587_p3, %s1786_s28), 1  ;;  %vm2093_vm1 = vmmov 0   ;;  %v900_v63 = vlaneseq }
   0xf   : > { %1870 = vmatprep.subr.bf16.mxu0 %v2092_v0  ;;  %1876 = vmatprep.subr.bf16.mxu1 %v2092_v0  ;;  %v639_v2 = vsel %vm637_vm0, %v625_v1, 0  ;;  %s1978_s0 = smul.u32 24, %s2445_s28  ;;  %vm609_vm2 = vcmask 1046528   ;;  %vm621_vm3 = vcmask 31744   ;;  %vm633_vm4 = vcmask 64512   ;;  %v2024_v18 = vld [vmem:[%s2424_s5 + $0x8] sm:$0xff]  }
  0x10   : > { %1871 = vmatpush3.bf16.msra.mxu0 %v639_v2  ;;  %1872 = vmatprep.mubr.msk.bf16.mxu0 %vm2093_vm1, %v2092_v0  ;;  %v2025_v19 = vld [vmem:[%s2424_s5] sm:$0xff]   ;;  %v2026_v20 = vld [vmem:[%s2426_s7 + $0x8] sm:$0xff]   ;;  %vm708_vm5 = vcmask 261120   ;;  %s597_s30 = scalar_lea.vmem %s2443_s29, %s2445_s28  ;;  %v901_v2 = vshrl.u32 %v900_v63, 7  ;;  %vm1033_vm6 = vcmask 130048   ;;  %s2104_s29 = smov 40  }
  0x11   : > { %1880 = vmatprep.mubr.msk.bf16.mxu1 %vm2093_vm1, %v2092_v0  ;;  %1884 = vmatprep.subr.bf16.mxu0 %v2092_v0  ;;  %s591_s21 = scalar_lea.vmem %s2441_s20, %s1978_s0  ;;  %v2028_v21 = vld [vmem:[%s2426_s7] sm:$0xff]   ;;  %s2442_s20 = sld [smem:[#allocation3_spill]]  ;;  %v2027_v33 = vld [vmem:[%s2428_s9 + $0x8] sm:$0xff]   ;;  %vm1501_vm7 = vcmask 195584  }
  0x12   : > { %v603_v3 = vld [vmem:[%s591_s21] sm:$0xff]  ;;  %v604_v4 = vld [vmem:[%s591_s21 + $0x8] sm:$0xff]  ;;  %v605_v5 = vld [vmem:[%s591_s21 + $0x10] sm:$0x1]  ;;  %1877 = vmatpush3.bf16.msra.mxu1 %v2024_v18 }
  0x13   : > { %v610_v6 = vrot.slane %v603_v3, 1  ;;  %v611_v7 = vrot.slane %v604_v4, 1  ;;  %v613_v8 = vrot.slane %v605_v5, 1  ;;  %1878 = vmatprep.subr.bf16.mxu1 %v2092_v0  ;;  %v1793_v24 = vld [vmem:[%s2423_s4] ss:$0 sm:$0xff]  ;;  %v2030_v59 = vld [vmem:[%s2430_s11 + $0x8] sm:$0xff]  }
  0x14   : > { %v2029_v35 = vld [vmem:[%s2428_s9] sm:$0xff]  }
  0x15   : > { %v612_v9 = vsel %vm609_vm2, %v610_v6, %v611_v7  ;;  %v614_v10 = vsel %vm609_vm2, %v611_v7, %v613_v8  ;;  %v837_v36 = vld [vmem:[%s597_s30] sm:$0x1]  ;;  %v902_v6 = vsub.s32 0, %v901_v2  ;;  %s2105_s30 = smov 56  }
  0x16   : > { %v2004_v11 = vpack.i.bf16 %v614_v10, %v612_v9  ;;  %1879 = vmatpush3.bf16.msra.mxu1 %v2025_v19  ;;  %v838_v37 = vpack.c.bf16 %v837_v36, %v837_v36  ;;  %v1795_v42 = vld [vmem:[%s2425_s6] ss:$0 sm:$0xff] }
  0x17   : > { %1892 = vmatprep.subr.bf16.mxu1 %v2092_v0  ;;  %s594_s21 = scalar_lea.vmem %s2442_s20, %s2445_s28  ;;  %v2031_v60 = vld [vmem:[%s2430_s11] sm:$0xff]   ;;  %s2097_s20 = smov 80  }
  0x18   : > { %2005 = vrot.lane.b32.xlu0 %v2004_v11, %s2094_s22  ;;  %v775_v22 = vld [vmem:[%s594_s21] sm:$0x1]  ;;  %s2098_s21 = smov 120   ;;  %s2099_s22 = smov 72  }
  0x19   : > { %v776_v23 = vpack.c.bf16 %v775_v22, %v775_v22  ;;  %v843_v1 = vld [vmem:[%s2429_s10] sm:$0x1] }
  0x8a   : > { %v2006_v12 = vpop.permute.xlu0 %2005 }
  0x8b   : > { %v2008_v13 = vunpack.i.h.bf16 %v2006_v12  ;;  %v2007_v14 = vunpack.i.l.bf16 %v2006_v12 }
  0x8d   : > { %v623_v15 = vsel %vm621_vm3, %v604_v4, %v2008_v13  ;;  %v622_v16 = vsel %vm621_vm3, %v603_v3, %v2007_v14  ;;  %v781_v3 = vld [vmem:[%s2427_s8] sm:$0x1] }
  0x8e   : > { %v624_v17 = vpack.c.bf16 %v623_v15, %v622_v16 }
  0x90   : > { %1873 = vmatmul.mubr.msk.bf16.vlgmr.msra.gmra.mxu0 %vm633_vm4, %v624_v17 }
  0x91   : > { %1888 = vmatprep.mubr.msk.bf16.mxu0 %vm2093_vm1, %v2092_v0  ;;  %1885 = vmatpush3.bf16.msra.mxu0 %v2026_v20  ;;  %v1807_v20 = vld [vmem:[%s2431_s12] ss:$0 sm:$0xff] }
  0x92   : > { %1886 = vmatprep.subr.bf16.mxu0 %v2092_v0 }
  0x95   : > { %1887 = vmatpush3.bf16.msra.mxu0 %v2028_v21 }
  0x96   : > { %1900 = vmatprep.subr.bf16.mxu0 %v2092_v0 }
  0x98   : > { %1889 = vmatmul.mubr.msk.bf16.vlgmr.msra.gmra.mxu0 %vm708_vm5, %v776_v23 }
  0x99   : > { %1904 = vmatprep.mubr.msk.bf16.mxu0 %vm2093_vm1, %v2092_v0  ;;  %1901 = vmatpush3.bf16.msra.mxu0 %v2030_v59 }
  0x9a   : > { %1902 = vmatprep.subr.bf16.mxu0 %v2092_v0 }
  0x9d   : > { %1903 = vmatpush3.bf16.msra.mxu0 %v2031_v60 }
  0x9e   : > { %1914 = vmatprep.subr.bf16.mxu0 %v2092_v0 }
 0x150   : > { %v675_v25 = vpop.f32.mrf.mxu0 }
 0x151   : > { %v676_v27 = vadd.f32 %v1793_v24, %v675_v25 }
 0x152   : > { %v1874_v26 = vpop.f32.mrf.mxu0 }
 0x153   : > { %v682_v31 = vmax.f32 %v676_v27, 0.0 }
 0x154   : > { %v678_v28 = vpop.f32.mrf.mxu0 }
 0x155   : > { %v679_v29 = vadd.f32 %v1793_v24, %v678_v28 }
 0x156   : > { %v1875_v30 = vpop.f32.mrf.mxu0 }
 0x157   : > { %v683_v32 = vmax.f32 %v679_v29, 0.0 }
 0x158   : > { %v831_v38 = vpop.f32.mrf.mxu0 }
 0x159   : > { %v684_v34 = vpack.c.bf16 %v683_v32, %v682_v31  ;;  %v832_v5 = vadd.f32 %v831_v38, %v781_v3 }
 0x15a   : > { %v1890_v39 = vpop.f32.mrf.mxu0 }
 0x15b   : > { %1881 = vmatmul.mubr.msk.bf16.vlgmr.msra.gmra.mxu1 %vm708_vm5, %v684_v34  ;;  %v903_v8 = vrot.slane %v832_v5, %v902_v6 }
 0x15c   : > { %1893 = vmatpush3.bf16.msra.mxu1 %v2027_v33  ;;  %1896 = vmatprep.mubr.msk.bf16.mxu1 %vm2093_vm1, %v2092_v0  ;;  %v834_v40 = vpop.f32.mrf.mxu0 }
 0x15d   : > { %1894 = vmatprep.subr.bf16.mxu1 %v2092_v0 }
 0x15e   : > { %v1891_v41 = vpop.f32.mrf.mxu0 }
 0x160   : > { %1895 = vmatpush3.bf16.msra.mxu1 %v2029_v35 }
 0x161   : > { %1908 = vmatprep.subr.bf16.mxu1 %v2092_v0 }
 0x163   : > { %1897 = vmatmul.mubr.msk.bf16.vlgmr.msra.gmra.mxu1 %vm708_vm5, %v838_v37 }
 0x164   : > { %1910 = vmatprep.mubr.msk.bf16.mxu1 %vm2093_vm1, %v2092_v0 }
 0x21b   : > { %v746_v43 = vpop.f32.mrf.mxu1 }
 0x21c   : > { %v747_v44 = vadd.f32 %v1795_v42, %v746_v43 }
 0x21d   : > { %v1882_v45 = vpop.f32.mrf.mxu1 }
 0x21e   : > { %v1799_v46 = vmul.f32 -1.442695, %v747_v44 }
 0x21f   : > { %v749_v47 = vpop.f32.mrf.mxu1 }
 0x220   : > { %2036 = vpow2.f32 %v1799_v46  ;;  %v750_v48 = vadd.f32 %v1795_v42, %v749_v47 }
 0x221   : > { %v1883_v49 = vpop.f32.mrf.mxu1 }
 0x222   : > { %v1800_v50 = vmul.f32 -1.442695, %v750_v48 }
 0x223   : > { %v893_v51 = vpop.f32.mrf.mxu1 }
 0x224   : > { %2038 = vpow2.f32 %v1800_v50  ;;  %v894_v4 = vadd.f32 %v893_v51, %v843_v1 }
 0x225   : > { %v1898_v52 = vpop.f32.mrf.mxu1 }
 0x226   : > { %v899_v7 = vmax.f32 %v894_v4, 0.0 }
 0x227   : > { %v896_v53 = vpop.f32.mrf.mxu1 }
 0x228   : > { %v909_v10 = vrot.slane %v899_v7, %v902_v6 }
 0x229   : > { %v1899_v54 = vpop.f32.mrf.mxu1 }
 0x22d   : > { %v2037_v55 = vpop.eup %2036 }
 0x22e   : > { %v759_v56 = vadd.f32 1.0, %v2037_v55 }
 0x230   : > { %2040 = vrcp.f32 %v759_v56 }
 0x231   : > { %v2039_v57 = vpop.eup %2038 }
 0x232   : > { %v760_v58 = vadd.f32 1.0, %v2039_v57 }
 0x234   : > { %2042 = vrcp.f32 %v760_v58 }
 0x23d   : > { %v2041_v61 = vpop.eup %2040 }
 0x23e   : > { %767 = vrot.lane.b32.xlu0 %v2041_v61, %s2095_s24 }
 0x241   : > { %v2043_v62 = vpop.eup %2042 }
 0x242   : > { %769 = vrot.lane.b32.xlu1 %v2043_v62, %s2095_s24 }
 0x2b0   : > { %v768_v9 = vpop.permute.xlu0 %767 }
 0x2b1   : > { %v773_v11 = vmul.f32 %v768_v9, %v747_v44 }
 0x2b3   : > { %v904_v12 = vadd.f32 %v903_v8, %v773_v11 }
 0x2b4   : > { %v770_v13 = vpop.permute.xlu1 %769 }
 0x2b5   : > { %v2294_v14 = vadd.f32 %v909_v10, %v904_v12  ;;  %v774_v15 = vmul.f32 %v770_v13, %v750_v48 }
 0x2b7   : > { %v905_v16 = vadd.f32 %v903_v8, %v774_v15 }
 0x2b9   : > { %v2296_v17 = vadd.f32 %v909_v10, %v905_v16 }
 0x2bb   : > { %v912_v18 = vpack.c.bf16 %v2296_v17, %v2294_v14 }
 0x2bd   : > { %1905 = vmatmul.mubr.msk.bf16.vlgmr.msra.gmra.mxu0 %vm708_vm5, %v912_v18 }
 0x2be   : > { %1916 = vmatprep.mubr.msk.bf16.mxu0 %vm2093_vm1, %v2092_v0 }
 0x37d   : > { %v973_v19 = vpop.f32.mrf.mxu0 }
 0x37e   : > { %v974_v23 = vadd.f32 %v1807_v20, %v973_v19 }
 0x37f   : > { %v1906_v21 = vpop.f32.mrf.mxu0 }
 0x381   : > { %v976_v22 = vpop.f32.mrf.mxu0 }
 0x382   : > { %v977_v24 = vadd.f32 %v1807_v20, %v976_v22 }
 0x383   : > { %v1907_v25 = vpop.f32.mrf.mxu0 }
 0x384   : > { %v2306_v26 = vpack.c.bf16 %v977_v24, %v974_v23 }
 0x386   : > { %1106 = vrot.lane.b32.xlu0 %v2306_v26, %s2096_s1  ;;  %982 = vrot.lane.b32.xlu1 %v2306_v26, %s2095_s24  ;;  %s2106_s1 = smov 8  }
 0x38a   : > { %1229 = vrot.lane.b32.xlu0 %v2306_v26, %s2097_s20  ;;  %1104 = vrot.lane.b32.xlu1 %v2306_v26, %s2098_s21 }
 0x38e   : > { %1352 = vrot.lane.b32.xlu0 %v2306_v26, %s2099_s22  ;;  %1227 = vrot.lane.b32.xlu1 %v2306_v26, %s2100_s2  ;;  %s2107_s22 = smov 16   ;;  %s2108_s2 = smov 24  }
 0x392   : > { %1350 = vrot.lane.b32.xlu1 %v2306_v26, %s2101_s23 }
 0x3f8   : > { %v983_v27 = vpop.permute.xlu1 %982  ;;  %v1107_v29 = vpop.permute.xlu0 %1106 }
 0x3f9   : > { %v988_v28 = vsel %vm633_vm4, %v983_v27, 0  ;;  %v1112_v30 = vsel %vm633_vm4, %v1107_v29, 0 }
 0x3fa   : > { %1909 = vmatpush3.bf16.xpose.msra.mxu1 %v988_v28 }
 0x3fb   : > { %1920 = vmatprep.subr.bf16.mxu1 %v2092_v0 }
 0x3fc   : > { %v1230_v31 = vpop.permute.xlu0 %1229  ;;  %v1105_v32 = vpop.permute.xlu1 %1104 }
 0x3fd   : > { %v1235_v33 = vsel %vm633_vm4, %v1230_v31, 0 }
 0x400   : > { %v1353_v34 = vpop.permute.xlu0 %1352  ;;  %v1228_v35 = vpop.permute.xlu1 %1227 }
 0x401   : > { %1911 = vmatmul.mubr.msk.bf16.vlgmr.msra.gmra.mxu1 %vm633_vm4, %v2306_v26  ;;  %v1358_v36 = vsel %vm633_vm4, %v1353_v34, 0 }
 0x402   : > { %1921 = vmatpush3.bf16.xpose.msra.mxu1 %v1112_v30  ;;  %1922 = vmatprep.mubr.msk.bf16.mxu1 %vm2093_vm1, %v2092_v0 }
 0x403   : > { %1932 = vmatprep.subr.bf16.mxu1 %v2092_v0 }
 0x404   : > { %v1351_v37 = vpop.permute.xlu1 %1350 }
 0x409   : > { %1923 = vmatmul.mubr.msk.bf16.vlgmr.msra.gmra.mxu1 %vm633_vm4, %v1105_v32 }
 0x40a   : > { %1933 = vmatpush3.bf16.xpose.msra.mxu1 %v1235_v33  ;;  %1934 = vmatprep.mubr.msk.bf16.mxu1 %vm2093_vm1, %v2092_v0 }
 0x40b   : > { %1944 = vmatprep.subr.bf16.mxu1 %v2092_v0 }
 0x411   : > { %1935 = vmatmul.mubr.msk.bf16.vlgmr.msra.gmra.mxu1 %vm633_vm4, %v1228_v35 }
 0x412   : > { %1945 = vmatpush3.bf16.xpose.msra.mxu1 %v1358_v36  ;;  %1946 = vmatprep.mubr.msk.bf16.mxu1 %vm2093_vm1, %v2092_v0 }
 0x413   : > { %1956 = vmatprep.subr.bf16.mxu1 %v2092_v0 }
 0x419   : > { %1947 = vmatmul.mubr.msk.bf16.vlgmr.msra.gmra.mxu1 %vm633_vm4, %v1351_v37 }
 0x41a   : > { %1960 = vmatprep.mubr.msk.bf16.mxu1 %vm2093_vm1, %v2092_v0 }
 0x4c1   : > { %v1024_v38 = vpop.f32.mrf.mxu1 }
 0x4c2   : > { %v1031_v39 = vmul.f32 0.35355338, %v1024_v38 }
 0x4c3   : > { %v1912_v40 = vpop.f32.mrf.mxu1 }
 0x4c4   : > { %v1034_v41 = vsel %vm1033_vm6, %v1031_v39, -inf }
 0x4c5   : > { %1035 = vmax.xlane.f32.xlu0 %v1034_v41  ;;  %v1027_v42 = vpop.f32.mrf.mxu1 }
 0x4c6   : > { %v1032_v43 = vmul.f32 0.35355338, %v1027_v42 }
 0x4c7   : > { %v1913_v44 = vpop.f32.mrf.mxu1 }
 0x4c8   : > { %v1037_v45 = vsel %vm1033_vm6, %v1032_v43, -inf }
 0x4c9   : > { %1038 = vmax.xlane.f32.xlu1 %v1037_v45  ;;  %v1148_v46 = vpop.f32.mrf.mxu1 }
 0x4ca   : > { %v1155_v47 = vmul.f32 0.35355338, %v1148_v46 }
 0x4cb   : > { %v1924_v48 = vpop.f32.mrf.mxu1 }
 0x4cc   : > { %v1157_v49 = vsel %vm1033_vm6, %v1155_v47, -inf }
 0x4cd   : > { %1158 = vmax.xlane.f32.xlu0 %v1157_v49  ;;  %v1151_v50 = vpop.f32.mrf.mxu1 }
 0x4ce   : > { %v1156_v51 = vmul.f32 0.35355338, %v1151_v50 }
 0x4cf   : > { %v1925_v52 = vpop.f32.mrf.mxu1 }
 0x4d0   : > { %v1160_v53 = vsel %vm1033_vm6, %v1156_v51, -inf }
 0x4d1   : > { %1161 = vmax.xlane.f32.xlu0 %v1160_v53  ;;  %v1271_v54 = vpop.f32.mrf.mxu1 }
 0x4d2   : > { %v1278_v55 = vmul.f32 0.35355338, %v1271_v54 }
 0x4d3   : > { %v1936_v56 = vpop.f32.mrf.mxu1 }
 0x4d4   : > { %v1280_v57 = vsel %vm1033_vm6, %v1278_v55, -inf }
 0x4d5   : > { %1281 = vmax.xlane.f32.xlu1 %v1280_v57  ;;  %v1274_v58 = vpop.f32.mrf.mxu1 }
 0x4d6   : > { %v1279_v59 = vmul.f32 0.35355338, %v1274_v58 }
 0x4d7   : > { %v1937_v60 = vpop.f32.mrf.mxu1 }
 0x4d8   : > { %v1283_v61 = vsel %vm1033_vm6, %v1279_v59, -inf }
 0x4d9   : > { %1284 = vmax.xlane.f32.xlu0 %v1283_v61  ;;  %v1394_v62 = vpop.f32.mrf.mxu1 }
 0x4da   : > { %v1401_v63 = vmul.f32 0.35355338, %v1394_v62 }
 0x4db   : > { %v1948_v1 = vpop.f32.mrf.mxu1 }
 0x4dc   : > { %v1403_v2 = vsel %vm1033_vm6, %v1401_v63, -inf }
 0x4dd   : > { %1404 = vmax.xlane.f32.xlu1 %v1403_v2  ;;  %v1397_v3 = vpop.f32.mrf.mxu1 }
 0x4de   : > { %v1402_v4 = vmul.f32 0.35355338, %v1397_v3 }
 0x4df   : > { %v1949_v5 = vpop.f32.mrf.mxu1 }
 0x4e0   : > { %v1406_v6 = vsel %vm1033_vm6, %v1402_v4, -inf }
 0x4e1   : > { %1407 = vmax.xlane.f32.xlu0 %v1406_v6 }
 0x4ee   : > { %1057 = vrot.lane.b32.xlu1 %v2306_v26, %s2102_s25 }
 0x54e   : > { %v1036_v7 = vpop.xlane.xlu0 %1035 }
 0x54f   : > { %v1040_v8 = vsub.f32 %v1031_v39, %v1036_v7 }
 0x551   : > { %v1042_v9 = vmul.f32 1.442695, %v1040_v8 }
 0x552   : > { %v1039_v10 = vpop.xlane.xlu1 %1038 }
 0x553   : > { %2044 = vpow2.f32 %v1042_v9  ;;  %v1041_v11 = vsub.f32 %v1032_v43, %v1039_v10 }
 0x555   : > { %v1044_v12 = vmul.f32 1.442695, %v1041_v11 }
 0x556   : > { %v1159_v13 = vpop.xlane.xlu0 %1158 }
 0x557   : > { %2046 = vpow2.f32 %v1044_v12  ;;  %v1163_v15 = vsub.f32 %v1155_v47, %v1159_v13 }
 0x559   : > { %v1165_v16 = vmul.f32 1.442695, %v1163_v15 }
 0x55a   : > { %v1162_v18 = vpop.xlane.xlu0 %1161 }
 0x55b   : > { %2048 = vpow2.f32 %v1165_v16  ;;  %v1164_v19 = vsub.f32 %v1156_v51, %v1162_v18 }
 0x55d   : > { %v1167_v20 = vmul.f32 1.442695, %v1164_v19 }
 0x55e   : > { %v1282_v21 = vpop.xlane.xlu1 %1281 }
 0x55f   : > { %2050 = vpow2.f32 %v1167_v20  ;;  %v1286_v22 = vsub.f32 %v1278_v55, %v1282_v21 }
 0x560   : > { %v2045_v23 = vpop.eup %2044 }
 0x561   : > { %v1288_v24 = vmul.f32 1.442695, %v1286_v22  ;;  %v1046_v25 = vsel %vm1033_vm6, %v2045_v23, 0.0 }
 0x562   : > { %v1285_v27 = vpop.xlane.xlu0 %1284  ;;  %1047 = vadd.xlane.f32.xlu1 %v1046_v25 }
 0x563   : > { %2052 = vpow2.f32 %v1288_v24  ;;  %v1287_v28 = vsub.f32 %v1279_v59, %v1285_v27 }
 0x564   : > { %v2047_v29 = vpop.eup %2046 }
 0x565   : > { %v1290_v30 = vmul.f32 1.442695, %v1287_v28  ;;  %v1049_v31 = vsel %vm1033_vm6, %v2047_v29, 0.0  ;;  %v2032_v28 = vld [vmem:[%s2432_s13 + $0x8] sm:$0xff]  }
 0x566   : > { %1050 = vadd.xlane.f32.xlu0 %v1049_v31  ;;  %v1405_v32 = vpop.xlane.xlu1 %1404  ;;  %1957 = vmatpush3.bf16.msra.mxu1 %v2032_v28 }
 0x567   : > { %2054 = vpow2.f32 %v1290_v30  ;;  %v1409_v33 = vsub.f32 %v1401_v63, %v1405_v32  ;;  %1958 = vmatprep.subr.bf16.mxu1 %v2092_v0 }
 0x568   : > { %v2049_v34 = vpop.eup %2048 }
 0x569   : > { %v1411_v35 = vmul.f32 1.442695, %v1409_v33  ;;  %v1169_v36 = vsel %vm1033_vm6, %v2049_v34, 0.0  ;;  %v2033_v33 = vld [vmem:[%s2432_s13] sm:$0xff]  }
 0x56a   : > { %1170 = vadd.xlane.f32.xlu1 %v1169_v36  ;;  %v1408_v37 = vpop.xlane.xlu0 %1407  ;;  %v1058_v38 = vpop.permute.xlu1 %1057  ;;  %1959 = vmatpush3.bf16.msra.mxu1 %v2033_v33 }
 0x56b   : > { %2056 = vpow2.f32 %v1411_v35  ;;  %v1410_v39 = vsub.f32 %v1402_v4, %v1408_v37  ;;  %1915 = vmatpush3.bf16.msra.mxu0 %v1058_v38  ;;  %1972 = vmatprep.subr.bf16.mxu1 %v2092_v0 }
 0x56c   : > { %v2051_v40 = vpop.eup %2050  ;;  %1926 = vmatprep.subr.bf16.mxu0 %v2092_v0 }
 0x56d   : > { %v1413_v41 = vmul.f32 1.442695, %v1410_v39  ;;  %v1172_v42 = vsel %vm1033_vm6, %v2051_v40, 0.0 }
 0x56e   : > { %1173 = vadd.xlane.f32.xlu0 %v1172_v42 }
 0x56f   : > { %2058 = vpow2.f32 %v1413_v41 }
 0x570   : > { %v2053_v43 = vpop.eup %2052 }
 0x571   : > { %v1292_v44 = vsel %vm1033_vm6, %v2053_v43, 0.0 }
 0x572   : > { %1293 = vadd.xlane.f32.xlu1 %v1292_v44 }
 0x574   : > { %v2055_v45 = vpop.eup %2054 }
 0x575   : > { %v1295_v46 = vsel %vm1033_vm6, %v2055_v45, 0.0 }
 0x576   : > { %1296 = vadd.xlane.f32.xlu0 %v1295_v46 }
 0x578   : > { %v2057_v47 = vpop.eup %2056 }
 0x579   : > { %v1415_v48 = vsel %vm1033_vm6, %v2057_v47, 0.0 }
 0x57a   : > { %1416 = vadd.xlane.f32.xlu1 %v1415_v48 }
 0x57c   : > { %v2059_v49 = vpop.eup %2058 }
 0x57d   : > { %v1418_v50 = vsel %vm1033_vm6, %v2059_v49, 0.0 }
 0x57e   : > { %1419 = vadd.xlane.f32.xlu0 %v1418_v50 }
 0x58b   : > { %1303 = vrot.lane.b32.xlu1 %v2306_v26, %s2103_s26 }
 0x58f   : > { %1426 = vrot.lane.b32.xlu1 %v2306_v26, %s2104_s29 }
 0x594   : > { %1180 = vrot.lane.b32.xlu0 %v2306_v26, %s2105_s30 }
 0x5eb   : > { %v1048_v51 = vpop.xlane.xlu1 %1047 }
 0x5ec   : > { %2060 = vrcp.f32 %v1048_v51 }
 0x5ef   : > { %v1051_v52 = vpop.xlane.xlu0 %1050 }
 0x5f0   : > { %2062 = vrcp.f32 %v1051_v52 }
 0x5f3   : > { %v1171_v54 = vpop.xlane.xlu1 %1170 }
 0x5f7   : > { %v1174_v53 = vpop.xlane.xlu0 %1173 }
 0x5f8   : > { %2064 = vrcp.f32 %v1174_v53 }
 0x5f9   : > { %v2061_v55 = vpop.eup %2060  ;;  %2066 = vrcp.f32 %v1171_v54 }
 0x5fa   : > { %v1054_v57 = vmul.f32 %v2061_v55, %v2045_v23 }
 0x5fb   : > { %v1294_v60 = vpop.xlane.xlu1 %1293 }
 0x5fd   : > { %v2063_v56 = vpop.eup %2062 }
 0x5fe   : > { %v1055_v58 = vmul.f32 %v2063_v56, %v2047_v29 }
 0x5ff   : > { %v1297_v59 = vpop.xlane.xlu0 %1296 }
 0x600   : > { %v1056_v61 = vpack.c.bf16 %v1055_v58, %v1054_v57  ;;  %2068 = vrcp.f32 %v1297_v59  ;;  %v2034_v58 = vld [vmem:[%s2434_s15 + $0x8] sm:$0xff]   ;;  %v2035_v59 = vld [vmem:[%s2434_s15] sm:$0xff]  }
 0x601   : > { %2070 = vrcp.f32 %v1294_v60 }
 0x602   : > { %1917 = vmatmul.mubr.msk.bf16.vlgmr.msra.gmra.mxu0 %vm1033_vm6, %v1056_v61 }
 0x603   : > { %1928 = vmatprep.mubr.msk.bf16.mxu0 %vm2093_vm1, %v2092_v0  ;;  %v1417_v1 = vpop.xlane.xlu1 %1416 }
 0x605   : > { %v2065_v26 = vpop.eup %2064 }
 0x606   : > { %v2067_v63 = vpop.eup %2066  ;;  %v1178_v2 = vmul.f32 %v2065_v26, %v2051_v40 }
 0x607   : > { %v1420_v62 = vpop.xlane.xlu0 %1419  ;;  %v1177_v4 = vmul.f32 %v2067_v63, %v2049_v34  ;;  %v1304_v7 = vpop.permute.xlu1 %1303 }
 0x608   : > { %2072 = vrcp.f32 %v1420_v62  ;;  %v1822_v62 = vld [vmem:[%s2433_s14] ss:$0 sm:$0xff] }
 0x609   : > { %2074 = vrcp.f32 %v1417_v1  ;;  %v1179_v5 = vpack.c.bf16 %v1178_v2, %v1177_v4 }
 0x60b   : > { %v1181_v3 = vpop.permute.xlu0 %1180  ;;  %v1427_v13 = vpop.permute.xlu1 %1426 }
 0x60c   : > { %1927 = vmatpush3.bf16.msra.mxu0 %v1181_v3 }
 0x60d   : > { %1938 = vmatprep.subr.bf16.mxu0 %v2092_v0  ;;  %v2069_v6 = vpop.eup %2068 }
 0x60e   : > { %v2071_v8 = vpop.eup %2070  ;;  %v1301_v9 = vmul.f32 %v2069_v6, %v2055_v45 }
 0x60f   : > { %1929 = vmatmul.mubr.msk.bf16.vlgmr.msra.gmra.mxu0 %vm1033_vm6, %v1179_v5  ;;  %v1300_v10 = vmul.f32 %v2071_v8, %v2053_v43  ;;  %v1823_v5 = vld [vmem:[%s2435_s16] ss:$0 sm:$0xff] }
 0x610   : > { %1939 = vmatpush3.bf16.msra.mxu0 %v1304_v7  ;;  %1940 = vmatprep.mubr.msk.bf16.mxu0 %vm2093_vm1, %v2092_v0 }
 0x611   : > { %1950 = vmatprep.subr.bf16.mxu0 %v2092_v0  ;;  %v1302_v11 = vpack.c.bf16 %v1301_v9, %v1300_v10 }
 0x615   : > { %v2073_v12 = vpop.eup %2072 }
 0x616   : > { %v2075_v15 = vpop.eup %2074  ;;  %v1424_v16 = vmul.f32 %v2073_v12, %v2059_v49 }
 0x617   : > { %1941 = vmatmul.mubr.msk.bf16.vlgmr.msra.gmra.mxu0 %vm1033_vm6, %v1302_v11  ;;  %v1423_v18 = vmul.f32 %v2075_v15, %v2057_v47 }
 0x618   : > { %1951 = vmatpush3.bf16.msra.mxu0 %v1427_v13  ;;  %1952 = vmatprep.mubr.msk.bf16.mxu0 %vm2093_vm1, %v2092_v0 }
 0x619   : > { %1964 = vmatprep.subr.bf16.mxu0 %v2092_v0  ;;  %v1425_v19 = vpack.c.bf16 %v1424_v16, %v1423_v18 }
 0x61f   : > { %1953 = vmatmul.mubr.msk.bf16.vlgmr.msra.gmra.mxu0 %vm1033_vm6, %v1425_v19 }
 0x620   : > { %1968 = vmatprep.mubr.msk.bf16.mxu0 %vm2093_vm1, %v2092_v0  ;;  %1965 = vmatpush3.bf16.msra.mxu0 %v2034_v58 }
 0x621   : > { %1966 = vmatprep.subr.bf16.mxu0 %v2092_v0 }
 0x624   : > { %1967 = vmatpush3.bf16.msra.mxu0 %v2035_v59 }
 0x6c2   : > { %v1097_v20 = vpop.f32.mrf.mxu0 }
 0x6c4   : > { %v1918_v21 = vpop.f32.mrf.mxu0 }
 0x6c6   : > { %v1100_v22 = vpop.f32.mrf.mxu0 }
 0x6c8   : > { %v1919_v23 = vpop.f32.mrf.mxu0 }
 0x6cf   : > { %v1220_v24 = vpop.f32.mrf.mxu0 }
 0x6d1   : > { %v1930_v25 = vpop.f32.mrf.mxu0 }
 0x6d3   : > { %v1223_v27 = vpop.f32.mrf.mxu0 }
 0x6d4   : > { %v2009_v29 = vpack.i.bf16 %v1223_v27, %v1220_v24  ;;  %v1666_v27 = vld [vmem:[%s2436_s17] sm:$0xf] }
 0x6d5   : > { %v1931_v30 = vpop.f32.mrf.mxu0 }
 0x6d6   : > { %2010 = vrot.lane.b32.xlu0 %v2009_v29, %s2106_s1 }
 0x6d7   : > { %v1343_v31 = vpop.f32.mrf.mxu0 }
 0x6d9   : > { %v1942_v32 = vpop.f32.mrf.mxu0 }
 0x6db   : > { %v1346_v34 = vpop.f32.mrf.mxu0 }
 0x6dc   : > { %v2014_v35 = vpack.i.bf16 %v1346_v34, %v1343_v31 }
 0x6dd   : > { %v1943_v36 = vpop.f32.mrf.mxu0 }
 0x6de   : > { %2015 = vrot.lane.b32.xlu1 %v2014_v35, %s2107_s22  ;;  %s1792_s22 = sshll.u32 %s2445_s28, 3 }
 0x6df   : > { %v1466_v37 = vpop.f32.mrf.mxu0  ;;  %s601_s25 = scalar_lea.vmem %s2437_s18, %s1792_s22 }
 0x6e1   : > { %v1954_v38 = vpop.f32.mrf.mxu0 }
 0x6e3   : > { %v1469_v39 = vpop.f32.mrf.mxu0 }
 0x6e4   : > { %v2019_v40 = vpack.i.bf16 %v1469_v39, %v1466_v37 }
 0x6e5   : > { %v1955_v41 = vpop.f32.mrf.mxu0 }
 0x6e6   : > { %2020 = vrot.lane.b32.xlu0 %v2019_v40, %s2108_s2 }
 0x748   : > { %v2011_v42 = vpop.permute.xlu0 %2010 }
 0x749   : > { %v2013_v44 = vunpack.i.h.bf16 %v2011_v42  ;;  %v2012_v45 = vunpack.i.l.bf16 %v2011_v42 }
 0x74b   : > { %v1498_v49 = vsel %vm633_vm4, %v1100_v22, %v2013_v44  ;;  %v1497_v50 = vsel %vm633_vm4, %v1097_v20, %v2012_v45 }
 0x750   : > { %v2016_v43 = vpop.permute.xlu1 %2015 }
 0x751   : > { %v2018_v46 = vunpack.i.h.bf16 %v2016_v43  ;;  %v2017_v47 = vunpack.i.l.bf16 %v2016_v43 }
 0x753   : > { %v1500_v53 = vsel %vm1033_vm6, %v1498_v49, %v2018_v46  ;;  %v1499_v54 = vsel %vm1033_vm6, %v1497_v50, %v2017_v47 }
 0x758   : > { %v2021_v48 = vpop.permute.xlu0 %2020 }
 0x759   : > { %v2023_v51 = vunpack.i.h.bf16 %v2021_v48  ;;  %v2022_v52 = vunpack.i.l.bf16 %v2021_v48 }
 0x75b   : > { %v1503_v55 = vsel %vm1501_vm7, %v1500_v53, %v2023_v51  ;;  %v1502_v56 = vsel %vm1501_vm7, %v1499_v54, %v2022_v52 }
 0x75c   : > { %v1504_v57 = vpack.c.bf16 %v1503_v55, %v1502_v56 }
 0x75e   : > { %1961 = vmatmul.mubr.msk.bf16.vlgmr.msra.gmra.mxu1 %vm708_vm5, %v1504_v57 }
 0x75f   : > { %1974 = vmatprep.mubr.msk.bf16.mxu1 %vm2093_vm1, %v2092_v0 }
 0x81e   : > { %v1558_v60 = vpop.f32.mrf.mxu1 }
 0x81f   : > { %v1565_v26 = vadd.f32 %v1558_v60, %v2294_v14 }
 0x820   : > { %v1962_v61 = vpop.f32.mrf.mxu1 }
 0x821   : > { %v1574_v3 = vadd.f32 %v1822_v62, %v1565_v26 }
 0x822   : > { %v1561_v63 = vpop.f32.mrf.mxu1 }
 0x823   : > { %v1566_v1 = vadd.f32 %v1561_v63, %v2296_v17 }
 0x824   : > { %v1963_v2 = vpop.f32.mrf.mxu1 }
 0x825   : > { %v1575_v4 = vadd.f32 %v1822_v62, %v1566_v1 }
 0x827   : > { %v1576_v0 = vpack.c.bf16 %v1575_v4, %v1574_v3 }
 0x829   : > { %1969 = vmatmul.mubr.msk.bf16.vlgmr.msra.gmra.mxu0 %vm708_vm5, %v1576_v0 }
 0x8e9   : > { %v1637_v6 = vpop.f32.mrf.mxu0 }
 0x8ea   : > { %v1638_v7 = vadd.f32 %v1823_v5, %v1637_v6 }
 0x8eb   : > { %v1970_v14 = vpop.f32.mrf.mxu0 }
 0x8ec   : > { %v1827_v8 = vmul.f32 -1.442695, %v1638_v7 }
 0x8ed   : > { %v1640_v9 = vpop.f32.mrf.mxu0 }
 0x8ee   : > { %2076 = vpow2.f32 %v1827_v8  ;;  %v1641_v10 = vadd.f32 %v1823_v5, %v1640_v9 }
 0x8ef   : > { %v1971_v11 = vpop.f32.mrf.mxu0 }
 0x8f0   : > { %v1828_v12 = vmul.f32 -1.442695, %v1641_v10 }
 0x8f2   : > { %2078 = vpow2.f32 %v1828_v12 }
 0x8fb   : > { %v2077_v17 = vpop.eup %2076 }
 0x8fc   : > { %v1650_v13 = vadd.f32 1.0, %v2077_v17 }
 0x8fe   : > { %2080 = vrcp.f32 %v1650_v13 }
 0x8ff   : > { %v2079_v15 = vpop.eup %2078 }
 0x900   : > { %v1651_v16 = vadd.f32 1.0, %v2079_v15 }
 0x902   : > { %2082 = vrcp.f32 %v1651_v16 }
 0x90b   : > { %v2081_v18 = vpop.eup %2080 }
 0x90c   : > { %1658 = vrot.lane.b32.xlu1 %v2081_v18, %s2095_s24 }
 0x90f   : > { %v2083_v19 = vpop.eup %2082 }
 0x910   : > { %1660 = vrot.lane.b32.xlu0 %v2083_v19, %s2095_s24 }
 0x97e   : > { %v1659_v20 = vpop.permute.xlu1 %1658 }
 0x97f   : > { %v1664_v22 = vmul.f32 %v1659_v20, %v1638_v7 }
 0x982   : > { %v1661_v21 = vpop.permute.xlu0 %1660 }
 0x983   : > { %v1665_v23 = vmul.f32 %v1661_v21, %v1641_v10 }
 0x985   : > { %v1667_v24 = vpack.c.bf16 %v1665_v23, %v1664_v22 }
 0x987   : > { %v1672_v25 = vsel %vm708_vm5, %v1667_v24, 0 }
 0x988   : > { %1973 = vmatpush3.bf16.xpose.msra.mxu1 %v1672_v25 }
 0x98f   : > { %1975 = vmatmul.mubr.msk.bf16.vlgmr.msra.gmra.mxu1 %vm708_vm5, %v1666_v27 }
 0xa4f   : > { %v1708_v28 = vpop.f32.mrf.mxu1 }
 0xa50   : > { %1714 = vst.msk [vmem:[%s601_s25] sm:$0xff] %vm1033_vm6, %v1708_v28 }
 0xa51   : > { %v1976_v29 = vpop.f32.mrf.mxu1 }
 0xa53   : > { %v1711_v30 = vpop.f32.mrf.mxu1 }
 0xa55   : > { %v1977_v31 = vpop.f32.mrf.mxu1 }
 0xa56 PF: > { %s28_s27 = sadd.s32 1, %s2090_s27  }
 0xa57   : > { %p25_p4 = scmp.ge.s32.totalorder %s28_s27, 4  }
 0xa59   :  { %27 = sbr.rel (!%p25_p4) target bundleno = 4 (0x4), region = 128 }

</bundles_post_ra>
